<compile_context>
chip_gen: v7x
topology: tpu7x:2x2x1
jax: 0.10.0
libtpu: 0.0.40
codegen_flags: <defaults>
</compile_context>

<pallas_src>
import functools

import jax
import jax.numpy as jnp
from jax.experimental import pallas as pl
from jax.experimental.pallas import tpu as pltpu


def _round_up(v, m=128):
    return ((v + m - 1) // m) * m


def _pad_to(a, shape):
    return jnp.pad(a, [(0, s - d) for d, s in zip(a.shape, shape)])


def _pick_tile_h(Ho, Wo, tile_h=None, target_rows=256, max_rows=2048):
    """Pick a row-tile height TH (a divisor of Ho).

    Auto mode targets M = TH*Wo >= ~256 rows so the 256-wide MXU on v6e/v7x is fed
    full tiles and per-grid-step overhead is amortised, capped so the bf16 scratch
    and double-buffered blocks stay well inside VMEM (64 MiB on v7x)."""
    divs = [d for d in range(1, Ho + 1) if Ho % d == 0]
    if tile_h is not None:                       # explicit cap (used by the tests)
        fit = [d for d in divs if d <= tile_h]
        return fit[-1] if fit else 1
    ok = [d for d in divs if d * Wo <= max_rows]
    if not ok:
        return 1
    for d in ok:
        if d * Wo >= target_rows:
            return d
    return ok[-1]


# ----------------------------------------------------------------------------
# In-kernel helpers.
# ----------------------------------------------------------------------------
def _conv1(x2d, w1_ref, b1_ref):
    """1x1 conv (+folded BN bias) + ReLU on an (M, Cin_p) bf16 slab -> (M, Cmid_p) f32."""
    y = jnp.dot(x2d, w1_ref[...], preferred_element_type=jnp.float32)
    return jnp.maximum(y + b1_ref[...], 0.0)


def _conv2_conv3(tap_fn, w2_ref, b2_ref, w3_ref, b3_ref, o_ref, m_rows):
    """9-tap 3x3 conv (+BN+ReLU) followed by 1x1 conv (+BN); writes the output tile.

    Taps are loaded one at a time inside the loop (keeps ~1 bf16 slab + the f32
    accumulator live instead of 9 slabs)."""
    acc = None
    for kh in range(3):
        for kw in range(3):
            lhs = tap_fn(kh, kw).reshape(m_rows, -1)            # already bf16
            part = jnp.dot(lhs, w2_ref[3 * kh + kw],
                           preferred_element_type=jnp.float32)
            acc = part if acc is None else acc + part
    y2 = jnp.maximum(acc + b2_ref[...], 0.0).astype(jnp.bfloat16)
    y3 = jnp.dot(y2, w3_ref[...], preferred_element_type=jnp.float32) + b3_ref[...]
    o_ref[...] = y3.reshape(o_ref.shape).astype(o_ref.dtype)


# ----------------------------------------------------------------------------
# Fused bottleneck kernel, stride == 1.
# ----------------------------------------------------------------------------
def _bottleneck_kernel_s1(xm_ref, xt_ref, xb_ref, w1_ref, b1_ref, w2_ref, b2_ref,
                          w3_ref, b3_ref, o_ref, sc_ref, *, TH, W, Cmid_p):
    i = pl.program_id(1)

    # Zero only the 1-pixel border of the bf16 conv1 scratch (interior is fully
    # overwritten below).  Done every grid step: required because the halo rows
    # are only conditionally written and grid axes are "parallel".
    zrow = jnp.zeros((1, W + 2, Cmid_p), jnp.bfloat16)
    zcol = jnp.zeros((TH + 2, 1, Cmid_p), jnp.bfloat16)
    sc_ref[pl.ds(0, 1), :, :] = zrow
    sc_ref[pl.ds(TH + 1, 1), :, :] = zrow
    sc_ref[:, pl.ds(0, 1), :] = zcol
    sc_ref[:, pl.ds(W + 1, 1), :] = zcol

    # conv1 (+BN+ReLU) on the main row tile.
    xm = xm_ref[...]                                            # (TH, W, Cin_p)
    y1 = _conv1(xm.reshape(TH * W, xm.shape[-1]), w1_ref, b1_ref)
    sc_ref[pl.ds(1, TH), pl.ds(1, W), :] = (
        y1.reshape(TH, W, Cmid_p).astype(jnp.bfloat16))

    @pl.when(i > 0)                                             # halo row above
    def _():
        xt = xt_ref[...]
        yt = _conv1(xt.reshape(W, xt.shape[-1]), w1_ref, b1_ref)
        sc_ref[pl.ds(0, 1), pl.ds(1, W), :] = (
            yt.reshape(1, W, Cmid_p).astype(jnp.bfloat16))

    @pl.when(i < pl.num_programs(1) - 1)                        # halo row below
    def _():
        xb = xb_ref[...]
        yb = _conv1(xb.reshape(W, xb.shape[-1]), w1_ref, b1_ref)
        sc_ref[pl.ds(TH + 1, 1), pl.ds(1, W), :] = (
            yb.reshape(1, W, Cmid_p).astype(jnp.bfloat16))

    _conv2_conv3(lambda kh, kw: sc_ref[pl.ds(kh, TH), pl.ds(kw, W), :],
                 w2_ref, b2_ref, w3_ref, b3_ref, o_ref, TH * W)


# ----------------------------------------------------------------------------
# Fused bottleneck kernel, stride == 2 (input is space-to-depth packed).
# ----------------------------------------------------------------------------
def _bottleneck_kernel_s2(xm_ref, xt_ref, w1_ref, b1_ref, w2_ref, b2_ref,
                          w3_ref, b3_ref, o_ref, see_ref, seo_ref, soe_ref,
                          soo_ref, *, TH, Wo, Cin_p, Cmid_p):
    i = pl.program_id(1)

    # Scratches hold the conv1 output split by (row parity, col parity) of the
    # original image so every stride-2 3x3 tap is a contiguous slice:
    #   see: odd rows / even cols   (+1 halo row on top)
    #   seo: odd rows / odd  cols   (+1 halo row, +1 zero column on the left)
    #   soe: even rows / even cols  (fully overwritten, no zeroing needed)
    #   soo: even rows / odd  cols  (+1 zero column on the left)
    # Zero only the border strips that are not (or only conditionally) written.
    see_ref[pl.ds(0, 1), :, :] = jnp.zeros((1, Wo, Cmid_p), jnp.bfloat16)
    seo_ref[pl.ds(0, 1), :, :] = jnp.zeros((1, Wo + 1, Cmid_p), jnp.bfloat16)
    seo_ref[:, pl.ds(0, 1), :] = jnp.zeros((TH + 1, 1, Cmid_p), jnp.bfloat16)
    soo_ref[:, pl.ds(0, 1), :] = jnp.zeros((TH, 1, Cmid_p), jnp.bfloat16)

    xm = xm_ref[...]                                            # (TH, Wo, 4*Cin_p)
    flat = xm.reshape(TH * Wo, 4 * Cin_p)
    y00 = _conv1(flat[:, 0 * Cin_p:1 * Cin_p], w1_ref, b1_ref)  # even row, even col
    y01 = _conv1(flat[:, 1 * Cin_p:2 * Cin_p], w1_ref, b1_ref)  # even row, odd  col
    y10 = _conv1(flat[:, 2 * Cin_p:3 * Cin_p], w1_ref, b1_ref)  # odd  row, even col
    y11 = _conv1(flat[:, 3 * Cin_p:4 * Cin_p], w1_ref, b1_ref)  # odd  row, odd  col

    soe_ref[...] = y00.reshape(TH, Wo, Cmid_p).astype(jnp.bfloat16)
    soo_ref[pl.ds(0, TH), pl.ds(1, Wo), :] = (
        y01.reshape(TH, Wo, Cmid_p).astype(jnp.bfloat16))
    see_ref[pl.ds(1, TH), pl.ds(0, Wo), :] = (
        y10.reshape(TH, Wo, Cmid_p).astype(jnp.bfloat16))
    seo_ref[pl.ds(1, TH), pl.ds(1, Wo), :] = (
        y11.reshape(TH, Wo, Cmid_p).astype(jnp.bfloat16))

    @pl.when(i > 0)                                             # halo row above
    def _():
        xt = xt_ref[...].reshape(Wo, 4 * Cin_p)
        halo_e = _conv1(xt[:, 2 * Cin_p:3 * Cin_p], w1_ref, b1_ref)
        halo_o = _conv1(xt[:, 3 * Cin_p:4 * Cin_p], w1_ref, b1_ref)
        see_ref[pl.ds(0, 1), pl.ds(0, Wo), :] = (
            halo_e.reshape(1, Wo, Cmid_p).astype(jnp.bfloat16))
        seo_ref[pl.ds(0, 1), pl.ds(1, Wo), :] = (
            halo_o.reshape(1, Wo, Cmid_p).astype(jnp.bfloat16))

    def tap(kh, kw):
        row_odd = (kh != 1)                 # original-image row parity of this tap
        col_odd = (kw != 1)
        r0 = 1 if kh == 2 else 0
        c0 = 1 if kw == 2 else 0
        if row_odd and not col_odd:
            src = see_ref
        elif row_odd and col_odd:
            src = seo_ref
        elif not row_odd and not col_odd:
            src = soe_ref
        else:
            src = soo_ref
        return src[pl.ds(r0, TH), pl.ds(c0, Wo), :]

    _conv2_conv3(tap, w2_ref, b2_ref, w3_ref, b3_ref, o_ref, TH * Wo)


# ----------------------------------------------------------------------------
# Parameter folding / packing + wrappers.
# ----------------------------------------------------------------------------
def _fold_bn(w_oihw, gamma, beta, mean, var, eps=1e-5):
    """Fold eval-mode BatchNorm into the preceding (bias-free) conv."""
    scale = gamma / jnp.sqrt(var + eps)
    w_f = w_oihw * scale[:, None, None, None]
    b_f = beta - mean * scale
    return w_f, b_f


def pack_regnet_bottleneck_params(params):
    """Pad/transpose folded conv weights into lane-dense GEMM operands (bf16)."""
    (w1, b1), (w2, b2), (w3, b3) = params
    Cmid, Cin = w1.shape[0], w1.shape[1]
    Cout = w3.shape[0]
    Cin_p, Cmid_p, Cout_p = _round_up(Cin), _round_up(Cmid), _round_up(Cout)
    return dict(
        w1=_pad_to(w1[:, :, 0, 0].T, (Cin_p, Cmid_p)).astype(jnp.bfloat16),
        w2=_pad_to(jnp.transpose(w2, (2, 3, 1, 0)).reshape(9, Cmid, Cmid),
                   (9, Cmid_p, Cmid_p)).astype(jnp.bfloat16),
        w3=_pad_to(w3[:, :, 0, 0].T, (Cmid_p, Cout_p)).astype(jnp.bfloat16),
        b1=_pad_to(b1.reshape(1, -1), (1, Cmid_p)).astype(jnp.float32),
        b2=_pad_to(b2.reshape(1, -1), (1, Cmid_p)).astype(jnp.float32),
        b3=_pad_to(b3.reshape(1, -1), (1, Cout_p)).astype(jnp.float32),
        Cin=Cin, Cmid=Cmid, Cout=Cout,
        Cin_p=Cin_p, Cmid_p=Cmid_p, Cout_p=Cout_p)


def regnet_bottleneck_nhwc(x_pad, packed, stride, tile_h=None):
    """Fused bottleneck on padded NHWC bf16 activations.

    x_pad: (N, H, W, Cin_p) bf16 with channels zero-padded to a multiple of 128.
    Returns (N, Ho, Wo, Cout_p) bf16 (padded NHWC, ready for the next block)."""
    N, H, W, Cin_p = x_pad.shape
    assert Cin_p == packed["Cin_p"]
    Cmid_p, Cout_p = packed["Cmid_p"], packed["Cout_p"]
    w_args = (packed["w1"], packed["b1"], packed["w2"], packed["b2"],
              packed["w3"], packed["b3"])
    # Resident-in-VMEM weight/bias specs (constant index maps -> fetched once).
    w_specs = [
        pl.BlockSpec((Cin_p, Cmid_p), lambda n, i: (0, 0)),
        pl.BlockSpec((1, Cmid_p), lambda n, i: (0, 0)),
        pl.BlockSpec((9, Cmid_p, Cmid_p), lambda n, i: (0, 0, 0)),
        pl.BlockSpec((1, Cmid_p), lambda n, i: (0, 0)),
        pl.BlockSpec((Cmid_p, Cout_p), lambda n, i: (0, 0)),
        pl.BlockSpec((1, Cout_p), lambda n, i: (0, 0)),
    ]
    w_bytes = ((Cin_p * Cmid_p + 9 * Cmid_p * Cmid_p + Cmid_p * Cout_p) * 2
               + (2 * Cmid_p + Cout_p) * 4)

    if stride == 1:
        Ho, Wo = H, W
        TH = _pick_tile_h(Ho, Wo, tile_h)
        grid = (N, Ho // TH)
        in_specs = [
            pl.BlockSpec((None, TH, W, Cin_p), lambda n, i: (n, i, 0, 0)),
            pl.BlockSpec((None, 1, W, Cin_p),
                         lambda n, i: (n, jnp.maximum(i * TH - 1, 0), 0, 0)),
            pl.BlockSpec((None, 1, W, Cin_p),
                         lambda n, i: (n, jnp.minimum((i + 1) * TH, H - 1), 0, 0)),
        ] + w_specs
        kernel = functools.partial(_bottleneck_kernel_s1, TH=TH, W=W, Cmid_p=Cmid_p)
        scratch = [pltpu.VMEM((TH + 2, W + 2, Cmid_p), jnp.bfloat16)]
        args = (x_pad, x_pad, x_pad) + w_args
        act_bytes = ((TH + 2) * W * Cin_p + TH * Wo * Cout_p) * 2
        scratch_bytes = (TH + 2) * (W + 2) * Cmid_p * 2
    elif stride == 2:
        assert H % 2 == 0 and W % 2 == 0, "stride-2 block expects even H, W"
        Ho, Wo = H // 2, W // 2
        # Space-to-depth: (N,H,W,C) -> (N,Ho,Wo,4C); sub-pixel (ph,pw) lives in
        # channels [(2*ph + pw) * Cin_p : ...]; makes every stride-2 tap contiguous.
        # TODO(synk): in a full network the previous block would store this layout
        # directly, avoiding the extra HBM pass.
        xs = x_pad.reshape(N, Ho, 2, Wo, 2, Cin_p)
        xs = jnp.transpose(xs, (0, 1, 3, 2, 4, 5)).reshape(N, Ho, Wo, 4 * Cin_p)
        TH = _pick_tile_h(Ho, Wo, tile_h)
        grid = (N, Ho // TH)
        in_specs = [
            pl.BlockSpec((None, TH, Wo, 4 * Cin_p), lambda n, i: (n, i, 0, 0)),
            pl.BlockSpec((None, 1, Wo, 4 * Cin_p),
                         lambda n, i: (n, jnp.maximum(i * TH - 1, 0), 0, 0)),
        ] + w_specs
        kernel = functools.partial(_bottleneck_kernel_s2, TH=TH, Wo=Wo,
                                   Cin_p=Cin_p, Cmid_p=Cmid_p)
        scratch = [
            pltpu.VMEM((TH + 1, Wo, Cmid_p), jnp.bfloat16),       # see
            pltpu.VMEM((TH + 1, Wo + 1, Cmid_p), jnp.bfloat16),   # seo
            pltpu.VMEM((TH, Wo, Cmid_p), jnp.bfloat16),           # soe
            pltpu.VMEM((TH, Wo + 1, Cmid_p), jnp.bfloat16),       # soo
        ]
        args = (xs, xs) + w_args
        act_bytes = ((TH + 1) * Wo * 4 * Cin_p + TH * Wo * Cout_p) * 2
        scratch_bytes = (2 * (TH + 1) + 2 * TH) * (Wo + 1) * Cmid_p * 2
    else:
        raise ValueError("RegNet uses stride 1 or 2 only")

    # Explicit scoped-VMEM budget: double-buffered activations/weights + scratch,
    # 1.5x headroom; floored at 32 MiB (v5e default is only 16 MiB), capped below
    # v7x's 64 MiB physical VMEM.
    vmem_limit = int(min(48 * 2**20,
                         max(32 * 2**20,
                             1.5 * (2 * (act_bytes + w_bytes) + scratch_bytes))))

    return pl.pallas_call(
        kernel,
        out_shape=jax.ShapeDtypeStruct((N, Ho, Wo, Cout_p), jnp.bfloat16),
        grid_spec=pltpu.PrefetchScalarGridSpec(
            num_scalar_prefetch=0,
            grid=grid,
            in_specs=in_specs,
            out_specs=pl.BlockSpec((None, TH, Wo, Cout_p),
                                   lambda n, i: (n, i, 0, 0)),
            scratch_shapes=scratch),
        compiler_params=pltpu.CompilerParams(
            dimension_semantics=("parallel", "parallel"),
            vmem_limit_bytes=vmem_limit),
    )(*args)


def regnet_bottleneck_forward(x_nchw, params, stride, tile_h=None):
    """NCHW f32 convenience wrapper matching RegNetBottleneck.forward (eval-mode BN).

    TODO(synk): in a full RegNet the NCHW<->NHWC transposes, channel pad/slice and
    f32 casts below are done once at the network boundary; between blocks use
    regnet_bottleneck_nhwc directly on padded NHWC bf16 activations (and fuse the
    RegNetUnit residual add + ReLU there)."""
    packed = pack_regnet_bottleneck_params(params)
    N, Cin, H, W = x_nchw.shape
    x = jnp.transpose(x_nchw, (0, 2, 3, 1))
    x = _pad_to(x, (N, H, W, packed["Cin_p"])).astype(jnp.bfloat16)
    out = regnet_bottleneck_nhwc(x, packed, stride, tile_h=tile_h)
    out = out[..., :packed["Cout"]].astype(jnp.float32)
    return jnp.transpose(out, (0, 3, 1, 2))  # NHWC -> NCHW


# ----------------------------------------------------------------------------
# Pure-JAX reference (lax.conv, f32) for correctness checking.
# ----------------------------------------------------------------------------
def reference_forward(x_nchw, params, stride):
    (w1, b1), (w2, b2), (w3, b3) = params

    def conv(x, w, b, s, pad, relu):
        y = jax.lax.conv_general_dilated(
            x, w, window_strides=(s, s), padding=pad,
            dimension_numbers=("NCHW", "OIHW", "NCHW"),
            precision=jax.lax.Precision.HIGHEST)
        y = y + b[None, :, None, None]
        return jnp.maximum(y, 0.0) if relu else y

    y = conv(x_nchw, w1, b1, 1, "VALID", True)
    y = conv(y, w2, b2, stride, ((1, 1), (1, 1)), True)
    y = conv(y, w3, b3, 1, "VALID", False)
    return y


if __name__ == "__main__":
    key = jax.random.PRNGKey(0)
    N, Cin, H, W = 2, 8, 16, 16
    Cout, bottleneck_factor = 16, 4
    Cmid = Cout // bottleneck_factor

    ks = jax.random.split(key, 8)
    x = jax.random.normal(ks[0], (N, Cin, H, W), jnp.float32)

    # Deterministic synthetic parameters (conv weights, OIHW like PyTorch).
    w1 = 0.1 * jax.random.normal(ks[1], (Cmid, Cin, 1, 1), jnp.float32)
    w2 = 0.1 * jax.random.normal(ks[2], (Cmid, Cmid, 3, 3), jnp.float32)
    w3 = 0.1 * jax.random.normal(ks[3], (Cout, Cmid, 1, 1), jnp.float32)

    def bn_params(k, c):
        k1, k2, k3, k4 = jax.random.split(k, 4)
        gamma = 1.0 + 0.1 * jax.random.normal(k1, (c,), jnp.float32)
        beta = 0.1 * jax.random.normal(k2, (c,), jnp.float32)
        mean = 0.1 * jax.random.normal(k3, (c,), jnp.float32)
        var = jnp.abs(jax.random.normal(k4, (c,), jnp.float32)) + 0.5
        return gamma, beta, mean, var

    # BatchNorm reproduced in eval mode (running stats) and folded into the convs.
    params = (
        _fold_bn(w1, *bn_params(ks[4], Cmid)),
        _fold_bn(w2, *bn_params(ks[5], Cmid)),
        _fold_bn(w3, *bn_params(ks[6], Cout)),
    )

    # Exercise both RegNet strides; small explicit tiles force the halo paths,
    # tile_h=None exercises the auto (MXU-sized) tile picker.
    for stride, tile_h in ((2, 4), (1, 8), (1, None)):
        out = jax.block_until_ready(
            regnet_bottleneck_forward(x, params, stride, tile_h=tile_h))
        ref = jax.block_until_ready(reference_forward(x, params, stride))
        assert out.shape == (N, Cout, H // stride, W // stride), out.shape
        max_err = float(jnp.max(jnp.abs(out - ref)))
        assert jnp.allclose(out, ref, atol=3e-2, rtol=3e-2), max_err

    print("KERNEL_OK")
</pallas_src>

<mosaic_0001>
module attributes {stable_mosaic.version = 11 : i64} {
  func.func @_bottleneck_kernel_s2(%arg0: i32, %arg1: i32, %arg2: memref<1x4x8x512xbf16, #tpu.memory_space<vmem>>, %arg3: memref<1x1x8x512xbf16, #tpu.memory_space<vmem>>, %arg4: memref<128x128xbf16, #tpu.memory_space<vmem>>, %arg5: memref<1x128xf32, #tpu.memory_space<vmem>>, %arg6: memref<9x128x128xbf16, #tpu.memory_space<vmem>>, %arg7: memref<1x128xf32, #tpu.memory_space<vmem>>, %arg8: memref<128x128xbf16, #tpu.memory_space<vmem>>, %arg9: memref<1x128xf32, #tpu.memory_space<vmem>>, %arg10: memref<1x4x8x128xbf16, #tpu.memory_space<vmem>>, %arg11: memref<5x8x128xbf16, #tpu.memory_space<vmem>>, %arg12: memref<5x9x128xbf16, #tpu.memory_space<vmem>>, %arg13: memref<4x8x128xbf16, #tpu.memory_space<vmem>>, %arg14: memref<4x9x128xbf16, #tpu.memory_space<vmem>>) attributes {dimension_semantics = [#tpu.dimension_semantics<parallel>, #tpu.dimension_semantics<parallel>], iteration_bounds = array<i64: 2, 2>, scalar_prefetch = 0 : i64, scratch_operands = 4 : i64, tpu.core_type = #tpu.core_type<tc>, window_params = [{transform_indices = @transform_0, window_bounds = array<i64: 1, 4, 8, 512>}, {transform_indices = @transform_1, window_bounds = array<i64: 1, 1, 8, 512>}, {pipeline_mode = #tpu.pipeline_mode<synchronous>, transform_indices = @transform_2, window_bounds = array<i64: 128, 128>}, {pipeline_mode = #tpu.pipeline_mode<synchronous>, transform_indices = @transform_3, window_bounds = array<i64: 1, 128>}, {pipeline_mode = #tpu.pipeline_mode<synchronous>, transform_indices = @transform_4, window_bounds = array<i64: 9, 128, 128>}, {pipeline_mode = #tpu.pipeline_mode<synchronous>, transform_indices = @transform_5, window_bounds = array<i64: 1, 128>}, {pipeline_mode = #tpu.pipeline_mode<synchronous>, transform_indices = @transform_6, window_bounds = array<i64: 128, 128>}, {pipeline_mode = #tpu.pipeline_mode<synchronous>, transform_indices = @transform_7, window_bounds = array<i64: 1, 128>}, {transform_indices = @transform_8, window_bounds = array<i64: 1, 4, 8, 128>}]} {
    %cst = arith.constant 0.000000e+00 : bf16
    %0 = vector.broadcast %cst : bf16 to vector<1x8x128xbf16>
    %c0 = arith.constant 0 : index
    %c0_0 = arith.constant 0 : index
    %c0_1 = arith.constant 0 : index
    %1 = vector.load %arg11[%c0, %c0_0, %c0_1] : memref<5x8x128xbf16, #tpu.memory_space<vmem>>, vector<1x8x128xbf16>
    tpu.vector_store %arg11[%c0, %c0_0, %c0_1], %0 {strides = array<i32>} : memref<5x8x128xbf16, #tpu.memory_space<vmem>>, vector<1x8x128xbf16>,
    %cst_2 = arith.constant 0.000000e+00 : bf16
    %2 = vector.broadcast %cst_2 : bf16 to vector<1x9x128xbf16>
    %c0_3 = arith.constant 0 : index
    %c0_4 = arith.constant 0 : index
    %c0_5 = arith.constant 0 : index
    %3 = vector.load %arg12[%c0_3, %c0_4, %c0_5] : memref<5x9x128xbf16, #tpu.memory_space<vmem>>, vector<1x9x128xbf16>
    tpu.vector_store %arg12[%c0_3, %c0_4, %c0_5], %2 {strides = array<i32>} : memref<5x9x128xbf16, #tpu.memory_space<vmem>>, vector<1x9x128xbf16>,
    %cst_6 = arith.constant 0.000000e+00 : bf16
    %4 = vector.broadcast %cst_6 : bf16 to vector<5x1x128xbf16>
    %c0_7 = arith.constant 0 : index
    %c0_8 = arith.constant 0 : index
    %c0_9 = arith.constant 0 : index
    %5 = vector.load %arg12[%c0_7, %c0_8, %c0_9] : memref<5x9x128xbf16, #tpu.memory_space<vmem>>, vector<5x1x128xbf16>
    tpu.vector_store %arg12[%c0_7, %c0_8, %c0_9], %4 {strides = array<i32>} : memref<5x9x128xbf16, #tpu.memory_space<vmem>>, vector<5x1x128xbf16>,
    %cst_10 = arith.constant 0.000000e+00 : bf16
    %6 = vector.broadcast %cst_10 : bf16 to vector<4x1x128xbf16>
    %c0_11 = arith.constant 0 : index
    %c0_12 = arith.constant 0 : index
    %c0_13 = arith.constant 0 : index
    %7 = vector.load %arg14[%c0_11, %c0_12, %c0_13] : memref<4x9x128xbf16, #tpu.memory_space<vmem>>, vector<4x1x128xbf16>
    tpu.vector_store %arg14[%c0_11, %c0_12, %c0_13], %6 {strides = array<i32>} : memref<4x9x128xbf16, #tpu.memory_space<vmem>>, vector<4x1x128xbf16>,
    %c0_14 = arith.constant 0 : index
    %c0_15 = arith.constant 0 : index
    %c0_16 = arith.constant 0 : index
    %c0_17 = arith.constant 0 : index
    %8 = vector.load %arg2[%c0_14, %c0_15, %c0_16, %c0_17] : memref<1x4x8x512xbf16, #tpu.memory_space<vmem>>, vector<1x4x8x512xbf16>
    %9 = vector.shape_cast %8 : vector<1x4x8x512xbf16> to vector<4x8x512xbf16>
    %10 = vector.shape_cast %9 : vector<4x8x512xbf16> to vector<32x512xbf16>
    %11 = vector.extract_strided_slice %10 {offsets = [0, 0], sizes = [32, 128], strides = [1, 1]} : vector<32x512xbf16> to vector<32x128xbf16>
    %c0_18 = arith.constant 0 : index
    %c0_19 = arith.constant 0 : index
    %12 = vector.load %arg4[%c0_18, %c0_19] : memref<128x128xbf16, #tpu.memory_space<vmem>>, vector<128x128xbf16>
    %cst_20 = arith.constant dense<0.000000e+00> : vector<32x128xf32>
    %13 = tpu.matmul %11, %12, %cst_20 {dimension_numbers = #tpu.dot_dimension_numbers<[1], [0], [0], [1], [0, 0, 1, 1], [], []>} : vector<32x128xbf16>, vector<128x128xbf16>, vector<32x128xf32> -> vector<32x128xf32>
    %c0_21 = arith.constant 0 : index
    %c0_22 = arith.constant 0 : index
    %14 = vector.load %arg5[%c0_21, %c0_22] : memref<1x128xf32, #tpu.memory_space<vmem>>, vector<1x128xf32>
    %15 = vector.broadcast %14 : vector<1x128xf32> to vector<32x128xf32>
    %16 = arith.addf %13, %15 : vector<32x128xf32>
    %cst_23 = arith.constant 0.000000e+00 : f32
    %17 = vector.broadcast %cst_23 : f32 to vector<32x128xf32>
    %18 = arith.maximumf %16, %17 : vector<32x128xf32>
    %19 = vector.extract_strided_slice %10 {offsets = [0, 128], sizes = [32, 128], strides = [1, 1]} : vector<32x512xbf16> to vector<32x128xbf16>
    %c0_24 = arith.constant 0 : index
    %c0_25 = arith.constant 0 : index
    %20 = vector.load %arg4[%c0_24, %c0_25] : memref<128x128xbf16, #tpu.memory_space<vmem>>, vector<128x128xbf16>
    %cst_26 = arith.constant dense<0.000000e+00> : vector<32x128xf32>
    %21 = tpu.matmul %19, %20, %cst_26 {dimension_numbers = #tpu.dot_dimension_numbers<[1], [0], [0], [1], [0, 0, 1, 1], [], []>} : vector<32x128xbf16>, vector<128x128xbf16>, vector<32x128xf32> -> vector<32x128xf32>
    %c0_27 = arith.constant 0 : index
    %c0_28 = arith.constant 0 : index
    %22 = vector.load %arg5[%c0_27, %c0_28] : memref<1x128xf32, #tpu.memory_space<vmem>>, vector<1x128xf32>
    %23 = vector.broadcast %22 : vector<1x128xf32> to vector<32x128xf32>
    %24 = arith.addf %21, %23 : vector<32x128xf32>
    %cst_29 = arith.constant 0.000000e+00 : f32
    %25 = vector.broadcast %cst_29 : f32 to vector<32x128xf32>
    %26 = arith.maximumf %24, %25 : vector<32x128xf32>
    %27 = vector.extract_strided_slice %10 {offsets = [0, 256], sizes = [32, 128], strides = [1, 1]} : vector<32x512xbf16> to vector<32x128xbf16>
    %c0_30 = arith.constant 0 : index
    %c0_31 = arith.constant 0 : index
    %28 = vector.load %arg4[%c0_30, %c0_31] : memref<128x128xbf16, #tpu.memory_space<vmem>>, vector<128x128xbf16>
    %cst_32 = arith.constant dense<0.000000e+00> : vector<32x128xf32>
    %29 = tpu.matmul %27, %28, %cst_32 {dimension_numbers = #tpu.dot_dimension_numbers<[1], [0], [0], [1], [0, 0, 1, 1], [], []>} : vector<32x128xbf16>, vector<128x128xbf16>, vector<32x128xf32> -> vector<32x128xf32>
    %c0_33 = arith.constant 0 : index
    %c0_34 = arith.constant 0 : index
    %30 = vector.load %arg5[%c0_33, %c0_34] : memref<1x128xf32, #tpu.memory_space<vmem>>, vector<1x128xf32>
    %31 = vector.broadcast %30 : vector<1x128xf32> to vector<32x128xf32>
    %32 = arith.addf %29, %31 : vector<32x128xf32>
    %cst_35 = arith.constant 0.000000e+00 : f32
    %33 = vector.broadcast %cst_35 : f32 to vector<32x128xf32>
    %34 = arith.maximumf %32, %33 : vector<32x128xf32>
    %35 = vector.extract_strided_slice %10 {offsets = [0, 384], sizes = [32, 128], strides = [1, 1]} : vector<32x512xbf16> to vector<32x128xbf16>
    %c0_36 = arith.constant 0 : index
    %c0_37 = arith.constant 0 : index
    %36 = vector.load %arg4[%c0_36, %c0_37] : memref<128x128xbf16, #tpu.memory_space<vmem>>, vector<128x128xbf16>
    %cst_38 = arith.constant dense<0.000000e+00> : vector<32x128xf32>
    %37 = tpu.matmul %35, %36, %cst_38 {dimension_numbers = #tpu.dot_dimension_numbers<[1], [0], [0], [1], [0, 0, 1, 1], [], []>} : vector<32x128xbf16>, vector<128x128xbf16>, vector<32x128xf32> -> vector<32x128xf32>
    %c0_39 = arith.constant 0 : index
    %c0_40 = arith.constant 0 : index
    %38 = vector.load %arg5[%c0_39, %c0_40] : memref<1x128xf32, #tpu.memory_space<vmem>>, vector<1x128xf32>
    %39 = vector.broadcast %38 : vector<1x128xf32> to vector<32x128xf32>
    %40 = arith.addf %37, %39 : vector<32x128xf32>
    %cst_41 = arith.constant 0.000000e+00 : f32
    %41 = vector.broadcast %cst_41 : f32 to vector<32x128xf32>
    %42 = arith.maximumf %40, %41 : vector<32x128xf32>
    %43 = vector.shape_cast %18 : vector<32x128xf32> to vector<4x8x128xf32>
    %44 = arith.truncf %43 : vector<4x8x128xf32> to vector<4x8x128xbf16>
    %c0_42 = arith.constant 0 : index
    %c0_43 = arith.constant 0 : index
    %c0_44 = arith.constant 0 : index
    %45 = vector.load %arg13[%c0_42, %c0_43, %c0_44] : memref<4x8x128xbf16, #tpu.memory_space<vmem>>, vector<4x8x128xbf16>
    tpu.vector_store %arg13[%c0_42, %c0_43, %c0_44], %44 {strides = array<i32>} : memref<4x8x128xbf16, #tpu.memory_space<vmem>>, vector<4x8x128xbf16>,
    %46 = vector.shape_cast %26 : vector<32x128xf32> to vector<4x8x128xf32>
    %47 = arith.truncf %46 : vector<4x8x128xf32> to vector<4x8x128xbf16>
    %c0_45 = arith.constant 0 : index
    %c1 = arith.constant 1 : index
    %c0_46 = arith.constant 0 : index
    %48 = vector.load %arg14[%c0_45, %c1, %c0_46] : memref<4x9x128xbf16, #tpu.memory_space<vmem>>, vector<4x8x128xbf16>
    tpu.vector_store %arg14[%c0_45, %c1, %c0_46], %47 {strides = array<i32>} : memref<4x9x128xbf16, #tpu.memory_space<vmem>>, vector<4x8x128xbf16>,
    %49 = vector.shape_cast %34 : vector<32x128xf32> to vector<4x8x128xf32>
    %50 = arith.truncf %49 : vector<4x8x128xf32> to vector<4x8x128xbf16>
    %c1_47 = arith.constant 1 : index
    %c0_48 = arith.constant 0 : index
    %c0_49 = arith.constant 0 : index
    %51 = vector.load %arg11[%c1_47, %c0_48, %c0_49] : memref<5x8x128xbf16, #tpu.memory_space<vmem>>, vector<4x8x128xbf16>
    tpu.vector_store %arg11[%c1_47, %c0_48, %c0_49], %50 {strides = array<i32>} : memref<5x8x128xbf16, #tpu.memory_space<vmem>>, vector<4x8x128xbf16>,
    %52 = vector.shape_cast %42 : vector<32x128xf32> to vector<4x8x128xf32>
    %53 = arith.truncf %52 : vector<4x8x128xf32> to vector<4x8x128xbf16>
    %c1_50 = arith.constant 1 : index
    %c1_51 = arith.constant 1 : index
    %c0_52 = arith.constant 0 : index
    %54 = vector.load %arg12[%c1_50, %c1_51, %c0_52] : memref<5x9x128xbf16, #tpu.memory_space<vmem>>, vector<4x8x128xbf16>
    tpu.vector_store %arg12[%c1_50, %c1_51, %c0_52], %53 {strides = array<i32>} : memref<5x9x128xbf16, #tpu.memory_space<vmem>>, vector<4x8x128xbf16>,
    %c0_i32 = arith.constant 0 : i32
    %55 = arith.cmpi sgt, %arg1, %c0_i32 : i32
    %56 = arith.extui %55 : i1 to i32
    %c0_i32_53 = arith.constant 0 : i32
    %57 = arith.cmpi ne, %56, %c0_i32_53 : i32
    scf.if %57 {
      %c0_122 = arith.constant 0 : index
      %c0_123 = arith.constant 0 : index
      %c0_124 = arith.constant 0 : index
      %c0_125 = arith.constant 0 : index
      %127 = vector.load %arg3[%c0_122, %c0_123, %c0_124, %c0_125] : memref<1x1x8x512xbf16, #tpu.memory_space<vmem>>, vector<1x1x8x512xbf16>
      %128 = vector.shape_cast %127 : vector<1x1x8x512xbf16> to vector<1x8x512xbf16>
      %129 = vector.shape_cast %128 : vector<1x8x512xbf16> to vector<8x512xbf16>
      %130 = vector.extract_strided_slice %129 {offsets = [0, 256], sizes = [8, 128], strides = [1, 1]} : vector<8x512xbf16> to vector<8x128xbf16>
      %c0_126 = arith.constant 0 : index
      %c0_127 = arith.constant 0 : index
      %131 = vector.load %arg4[%c0_126, %c0_127] : memref<128x128xbf16, #tpu.memory_space<vmem>>, vector<128x128xbf16>
      %cst_128 = arith.constant dense<0.000000e+00> : vector<8x128xf32>
      %132 = tpu.matmul %130, %131, %cst_128 {dimension_numbers = #tpu.dot_dimension_numbers<[1], [0], [0], [1], [0, 0, 1, 1], [], []>} : vector<8x128xbf16>, vector<128x128xbf16>, vector<8x128xf32> -> vector<8x128xf32>
      %c0_129 = arith.constant 0 : index
      %c0_130 = arith.constant 0 : index
      %133 = vector.load %arg5[%c0_129, %c0_130] : memref<1x128xf32, #tpu.memory_space<vmem>>, vector<1x128xf32>
      %134 = vector.broadcast %133 : vector<1x128xf32> to vector<8x128xf32>
      %135 = arith.addf %132, %134 : vector<8x128xf32>
      %cst_131 = arith.constant 0.000000e+00 : f32
      %136 = vector.broadcast %cst_131 : f32 to vector<8x128xf32>
      %137 = arith.maximumf %135, %136 : vector<8x128xf32>
      %138 = vector.extract_strided_slice %129 {offsets = [0, 384], sizes = [8, 128], strides = [1, 1]} : vector<8x512xbf16> to vector<8x128xbf16>
      %c0_132 = arith.constant 0 : index
      %c0_133 = arith.constant 0 : index
      %139 = vector.load %arg4[%c0_132, %c0_133] : memref<128x128xbf16, #tpu.memory_space<vmem>>, vector<128x128xbf16>
      %cst_134 = arith.constant dense<0.000000e+00> : vector<8x128xf32>
      %140 = tpu.matmul %138, %139, %cst_134 {dimension_numbers = #tpu.dot_dimension_numbers<[1], [0], [0], [1], [0, 0, 1, 1], [], []>} : vector<8x128xbf16>, vector<128x128xbf16>, vector<8x128xf32> -> vector<8x128xf32>
      %c0_135 = arith.constant 0 : index
      %c0_136 = arith.constant 0 : index
      %141 = vector.load %arg5[%c0_135, %c0_136] : memref<1x128xf32, #tpu.memory_space<vmem>>, vector<1x128xf32>
      %142 = vector.broadcast %141 : vector<1x128xf32> to vector<8x128xf32>
      %143 = arith.addf %140, %142 : vector<8x128xf32>
      %cst_137 = arith.constant 0.000000e+00 : f32
      %144 = vector.broadcast %cst_137 : f32 to vector<8x128xf32>
      %145 = arith.maximumf %143, %144 : vector<8x128xf32>
      %146 = vector.shape_cast %137 : vector<8x128xf32> to vector<1x8x128xf32>
      %147 = arith.truncf %146 : vector<1x8x128xf32> to vector<1x8x128xbf16>
      %c0_138 = arith.constant 0 : index
      %c0_139 = arith.constant 0 : index
      %c0_140 = arith.constant 0 : index
      %148 = vector.load %arg11[%c0_138, %c0_139, %c0_140] : memref<5x8x128xbf16, #tpu.memory_space<vmem>>, vector<1x8x128xbf16>
      tpu.vector_store %arg11[%c0_138, %c0_139, %c0_140], %147 {strides = array<i32>} : memref<5x8x128xbf16, #tpu.memory_space<vmem>>, vector<1x8x128xbf16>,
      %149 = vector.shape_cast %145 : vector<8x128xf32> to vector<1x8x128xf32>
      %150 = arith.truncf %149 : vector<1x8x128xf32> to vector<1x8x128xbf16>
      %c0_141 = arith.constant 0 : index
      %c1_142 = arith.constant 1 : index
      %c0_143 = arith.constant 0 : index
      %151 = vector.load %arg12[%c0_141, %c1_142, %c0_143] : memref<5x9x128xbf16, #tpu.memory_space<vmem>>, vector<1x8x128xbf16>
      tpu.vector_store %arg12[%c0_141, %c1_142, %c0_143], %150 {strides = array<i32>} : memref<5x9x128xbf16, #tpu.memory_space<vmem>>, vector<1x8x128xbf16>,
    } else {
    }
    %c0_54 = arith.constant 0 : index
    %c0_55 = arith.constant 0 : index
    %c0_56 = arith.constant 0 : index
    %58 = vector.load %arg12[%c0_54, %c0_55, %c0_56] : memref<5x9x128xbf16, #tpu.memory_space<vmem>>, vector<4x8x128xbf16>
    %59 = vector.shape_cast %58 : vector<4x8x128xbf16> to vector<32x128xbf16>
    %c0_57 = arith.constant 0 : index
    %c0_58 = arith.constant 0 : index
    %c0_59 = arith.constant 0 : index
    %60 = vector.load %arg6[%c0_57, %c0_58, %c0_59] : memref<9x128x128xbf16, #tpu.memory_space<vmem>>, vector<1x128x128xbf16>
    %61 = vector.shape_cast %60 : vector<1x128x128xbf16> to vector<128x128xbf16>
    %cst_60 = arith.constant dense<0.000000e+00> : vector<32x128xf32>
    %62 = tpu.matmul %59, %61, %cst_60 {dimension_numbers = #tpu.dot_dimension_numbers<[1], [0], [0], [1], [0, 0, 1, 1], [], []>} : vector<32x128xbf16>, vector<128x128xbf16>, vector<32x128xf32> -> vector<32x128xf32>
    %c0_61 = arith.constant 0 : index
    %c0_62 = arith.constant 0 : index
    %c0_63 = arith.constant 0 : index
    %63 = vector.load %arg11[%c0_61, %c0_62, %c0_63] : memref<5x8x128xbf16, #tpu.memory_space<vmem>>, vector<4x8x128xbf16>
    %64 = vector.shape_cast %63 : vector<4x8x128xbf16> to vector<32x128xbf16>
    %c1_64 = arith.constant 1 : index
    %c0_65 = arith.constant 0 : index
    %c0_66 = arith.constant 0 : index
    %65 = vector.load %arg6[%c1_64, %c0_65, %c0_66] : memref<9x128x128xbf16, #tpu.memory_space<vmem>>, vector<1x128x128xbf16>
    %66 = vector.shape_cast %65 : vector<1x128x128xbf16> to vector<128x128xbf16>
    %cst_67 = arith.constant dense<0.000000e+00> : vector<32x128xf32>
    %67 = tpu.matmul %64, %66, %cst_67 {dimension_numbers = #tpu.dot_dimension_numbers<[1], [0], [0], [1], [0, 0, 1, 1], [], []>} : vector<32x128xbf16>, vector<128x128xbf16>, vector<32x128xf32> -> vector<32x128xf32>
    %68 = arith.addf %62, %67 : vector<32x128xf32>
    %c0_68 = arith.constant 0 : index
    %c1_69 = arith.constant 1 : index
    %c0_70 = arith.constant 0 : index
    %69 = vector.load %arg12[%c0_68, %c1_69, %c0_70] : memref<5x9x128xbf16, #tpu.memory_space<vmem>>, vector<4x8x128xbf16>
    %70 = vector.shape_cast %69 : vector<4x8x128xbf16> to vector<32x128xbf16>
    %c2 = arith.constant 2 : index
    %c0_71 = arith.constant 0 : index
    %c0_72 = arith.constant 0 : index
    %71 = vector.load %arg6[%c2, %c0_71, %c0_72] : memref<9x128x128xbf16, #tpu.memory_space<vmem>>, vector<1x128x128xbf16>
    %72 = vector.shape_cast %71 : vector<1x128x128xbf16> to vector<128x128xbf16>
    %cst_73 = arith.constant dense<0.000000e+00> : vector<32x128xf32>
    %73 = tpu.matmul %70, %72, %cst_73 {dimension_numbers = #tpu.dot_dimension_numbers<[1], [0], [0], [1], [0, 0, 1, 1], [], []>} : vector<32x128xbf16>, vector<128x128xbf16>, vector<32x128xf32> -> vector<32x128xf32>
    %74 = arith.addf %68, %73 : vector<32x128xf32>
    %c0_74 = arith.constant 0 : index
    %c0_75 = arith.constant 0 : index
    %c0_76 = arith.constant 0 : index
    %75 = vector.load %arg14[%c0_74, %c0_75, %c0_76] : memref<4x9x128xbf16, #tpu.memory_space<vmem>>, vector<4x8x128xbf16>
    %76 = vector.shape_cast %75 : vector<4x8x128xbf16> to vector<32x128xbf16>
    %c3 = arith.constant 3 : index
    %c0_77 = arith.constant 0 : index
    %c0_78 = arith.constant 0 : index
    %77 = vector.load %arg6[%c3, %c0_77, %c0_78] : memref<9x128x128xbf16, #tpu.memory_space<vmem>>, vector<1x128x128xbf16>
    %78 = vector.shape_cast %77 : vector<1x128x128xbf16> to vector<128x128xbf16>
    %cst_79 = arith.constant dense<0.000000e+00> : vector<32x128xf32>
    %79 = tpu.matmul %76, %78, %cst_79 {dimension_numbers = #tpu.dot_dimension_numbers<[1], [0], [0], [1], [0, 0, 1, 1], [], []>} : vector<32x128xbf16>, vector<128x128xbf16>, vector<32x128xf32> -> vector<32x128xf32>
    %80 = arith.addf %74, %79 : vector<32x128xf32>
    %c0_80 = arith.constant 0 : index
    %c0_81 = arith.constant 0 : index
    %c0_82 = arith.constant 0 : index
    %81 = vector.load %arg13[%c0_80, %c0_81, %c0_82] : memref<4x8x128xbf16, #tpu.memory_space<vmem>>, vector<4x8x128xbf16>
    %82 = vector.shape_cast %81 : vector<4x8x128xbf16> to vector<32x128xbf16>
    %c4 = arith.constant 4 : index
    %c0_83 = arith.constant 0 : index
    %c0_84 = arith.constant 0 : index
    %83 = vector.load %arg6[%c4, %c0_83, %c0_84] : memref<9x128x128xbf16, #tpu.memory_space<vmem>>, vector<1x128x128xbf16>
    %84 = vector.shape_cast %83 : vector<1x128x128xbf16> to vector<128x128xbf16>
    %cst_85 = arith.constant dense<0.000000e+00> : vector<32x128xf32>
    %85 = tpu.matmul %82, %84, %cst_85 {dimension_numbers = #tpu.dot_dimension_numbers<[1], [0], [0], [1], [0, 0, 1, 1], [], []>} : vector<32x128xbf16>, vector<128x128xbf16>, vector<32x128xf32> -> vector<32x128xf32>
    %86 = arith.addf %80, %85 : vector<32x128xf32>
    %c0_86 = arith.constant 0 : index
    %c1_87 = arith.constant 1 : index
    %c0_88 = arith.constant 0 : index
    %87 = vector.load %arg14[%c0_86, %c1_87, %c0_88] : memref<4x9x128xbf16, #tpu.memory_space<vmem>>, vector<4x8x128xbf16>
    %88 = vector.shape_cast %87 : vector<4x8x128xbf16> to vector<32x128xbf16>
    %c5 = arith.constant 5 : index
    %c0_89 = arith.constant 0 : index
    %c0_90 = arith.constant 0 : index
    %89 = vector.load %arg6[%c5, %c0_89, %c0_90] : memref<9x128x128xbf16, #tpu.memory_space<vmem>>, vector<1x128x128xbf16>
    %90 = vector.shape_cast %89 : vector<1x128x128xbf16> to vector<128x128xbf16>
    %cst_91 = arith.constant dense<0.000000e+00> : vector<32x128xf32>
    %91 = tpu.matmul %88, %90, %cst_91 {dimension_numbers = #tpu.dot_dimension_numbers<[1], [0], [0], [1], [0, 0, 1, 1], [], []>} : vector<32x128xbf16>, vector<128x128xbf16>, vector<32x128xf32> -> vector<32x128xf32>
    %92 = arith.addf %86, %91 : vector<32x128xf32>
    %c1_92 = arith.constant 1 : index
    %c0_93 = arith.constant 0 : index
    %c0_94 = arith.constant 0 : index
    %93 = vector.load %arg12[%c1_92, %c0_93, %c0_94] : memref<5x9x128xbf16, #tpu.memory_space<vmem>>, vector<4x8x128xbf16>
    %94 = vector.shape_cast %93 : vector<4x8x128xbf16> to vector<32x128xbf16>
    %c6 = arith.constant 6 : index
    %c0_95 = arith.constant 0 : index
    %c0_96 = arith.constant 0 : index
    %95 = vector.load %arg6[%c6, %c0_95, %c0_96] : memref<9x128x128xbf16, #tpu.memory_space<vmem>>, vector<1x128x128xbf16>
    %96 = vector.shape_cast %95 : vector<1x128x128xbf16> to vector<128x128xbf16>
    %cst_97 = arith.constant dense<0.000000e+00> : vector<32x128xf32>
    %97 = tpu.matmul %94, %96, %cst_97 {dimension_numbers = #tpu.dot_dimension_numbers<[1], [0], [0], [1], [0, 0, 1, 1], [], []>} : vector<32x128xbf16>, vector<128x128xbf16>, vector<32x128xf32> -> vector<32x128xf32>
    %98 = arith.addf %92, %97 : vector<32x128xf32>
    %c1_98 = arith.constant 1 : index
    %c0_99 = arith.constant 0 : index
    %c0_100 = arith.constant 0 : index
    %99 = vector.load %arg11[%c1_98, %c0_99, %c0_100] : memref<5x8x128xbf16, #tpu.memory_space<vmem>>, vector<4x8x128xbf16>
    %100 = vector.shape_cast %99 : vector<4x8x128xbf16> to vector<32x128xbf16>
    %c7 = arith.constant 7 : index
    %c0_101 = arith.constant 0 : index
    %c0_102 = arith.constant 0 : index
    %101 = vector.load %arg6[%c7, %c0_101, %c0_102] : memref<9x128x128xbf16, #tpu.memory_space<vmem>>, vector<1x128x128xbf16>
    %102 = vector.shape_cast %101 : vector<1x128x128xbf16> to vector<128x128xbf16>
    %cst_103 = arith.constant dense<0.000000e+00> : vector<32x128xf32>
    %103 = tpu.matmul %100, %102, %cst_103 {dimension_numbers = #tpu.dot_dimension_numbers<[1], [0], [0], [1], [0, 0, 1, 1], [], []>} : vector<32x128xbf16>, vector<128x128xbf16>, vector<32x128xf32> -> vector<32x128xf32>
    %104 = arith.addf %98, %103 : vector<32x128xf32>
    %c1_104 = arith.constant 1 : index
    %c1_105 = arith.constant 1 : index
    %c0_106 = arith.constant 0 : index
    %105 = vector.load %arg12[%c1_104, %c1_105, %c0_106] : memref<5x9x128xbf16, #tpu.memory_space<vmem>>, vector<4x8x128xbf16>
    %106 = vector.shape_cast %105 : vector<4x8x128xbf16> to vector<32x128xbf16>
    %c8 = arith.constant 8 : index
    %c0_107 = arith.constant 0 : index
    %c0_108 = arith.constant 0 : index
    %107 = vector.load %arg6[%c8, %c0_107, %c0_108] : memref<9x128x128xbf16, #tpu.memory_space<vmem>>, vector<1x128x128xbf16>
    %108 = vector.shape_cast %107 : vector<1x128x128xbf16> to vector<128x128xbf16>
    %cst_109 = arith.constant dense<0.000000e+00> : vector<32x128xf32>
    %109 = tpu.matmul %106, %108, %cst_109 {dimension_numbers = #tpu.dot_dimension_numbers<[1], [0], [0], [1], [0, 0, 1, 1], [], []>} : vector<32x128xbf16>, vector<128x128xbf16>, vector<32x128xf32> -> vector<32x128xf32>
    %110 = arith.addf %104, %109 : vector<32x128xf32>
    %c0_110 = arith.constant 0 : index
    %c0_111 = arith.constant 0 : index
    %111 = vector.load %arg7[%c0_110, %c0_111] : memref<1x128xf32, #tpu.memory_space<vmem>>, vector<1x128xf32>
    %112 = vector.broadcast %111 : vector<1x128xf32> to vector<32x128xf32>
    %113 = arith.addf %110, %112 : vector<32x128xf32>
    %cst_112 = arith.constant 0.000000e+00 : f32
    %114 = vector.broadcast %cst_112 : f32 to vector<32x128xf32>
    %115 = arith.maximumf %113, %114 : vector<32x128xf32>
    %116 = arith.truncf %115 : vector<32x128xf32> to vector<32x128xbf16>
    %c0_113 = arith.constant 0 : index
    %c0_114 = arith.constant 0 : index
    %117 = vector.load %arg8[%c0_113, %c0_114] : memref<128x128xbf16, #tpu.memory_space<vmem>>, vector<128x128xbf16>
    %cst_115 = arith.constant dense<0.000000e+00> : vector<32x128xf32>
    %118 = tpu.matmul %116, %117, %cst_115 {dimension_numbers = #tpu.dot_dimension_numbers<[1], [0], [0], [1], [0, 0, 1, 1], [], []>} : vector<32x128xbf16>, vector<128x128xbf16>, vector<32x128xf32> -> vector<32x128xf32>
    %c0_116 = arith.constant 0 : index
    %c0_117 = arith.constant 0 : index
    %119 = vector.load %arg9[%c0_116, %c0_117] : memref<1x128xf32, #tpu.memory_space<vmem>>, vector<1x128xf32>
    %120 = vector.broadcast %119 : vector<1x128xf32> to vector<32x128xf32>
    %121 = arith.addf %118, %120 : vector<32x128xf32>
    %122 = vector.shape_cast %121 : vector<32x128xf32> to vector<4x8x128xf32>
    %123 = arith.truncf %122 : vector<4x8x128xf32> to vector<4x8x128xbf16>
    %c0_118 = arith.constant 0 : index
    %c0_119 = arith.constant 0 : index
    %c0_120 = arith.constant 0 : index
    %c0_121 = arith.constant 0 : index
    %124 = vector.load %arg10[%c0_118, %c0_119, %c0_120, %c0_121] : memref<1x4x8x128xbf16, #tpu.memory_space<vmem>>, vector<1x4x8x128xbf16>
    %125 = vector.shape_cast %124 : vector<1x4x8x128xbf16> to vector<4x8x128xbf16>
    %126 = vector.shape_cast %123 : vector<4x8x128xbf16> to vector<1x4x8x128xbf16>
    tpu.vector_store %arg10[%c0_118, %c0_119, %c0_120, %c0_121], %126 {strides = array<i32>} : memref<1x4x8x128xbf16, #tpu.memory_space<vmem>>, vector<1x4x8x128xbf16>,
    return
  }
  func.func @transform_0(%arg0: i32, %arg1: i32) -> (i32, i32, i32, i32) {
    %c0_i32 = arith.constant 0 : i32
    %c0_i32_0 = arith.constant 0 : i32
    %c0_i32_1 = arith.constant 0 : i32
    return %arg0, %arg1, %c0_i32, %c0_i32_0 : i32, i32, i32, i32
  }
  func.func @transform_1(%arg0: i32, %arg1: i32) -> (i32, i32, i32, i32) {
    %c4_i32 = arith.constant 4 : i32
    %0 = arith.muli %arg1, %c4_i32 : i32
    %c1_i32 = arith.constant 1 : i32
    %1 = arith.subi %0, %c1_i32 : i32
    %c0_i32 = arith.constant 0 : i32
    %2 = arith.maxsi %1, %c0_i32 : i32
    %c0_i32_0 = arith.constant 0 : i32
    %c0_i32_1 = arith.constant 0 : i32
    %c0_i32_2 = arith.constant 0 : i32
    return %arg0, %2, %c0_i32_0, %c0_i32_1 : i32, i32, i32, i32
  }
  func.func @transform_2(%arg0: i32, %arg1: i32) -> (i32, i32) {
    %c0_i32 = arith.constant 0 : i32
    %c0_i32_0 = arith.constant 0 : i32
    %c0_i32_1 = arith.constant 0 : i32
    return %c0_i32, %c0_i32_0 : i32, i32
  }
  func.func @transform_3(%arg0: i32, %arg1: i32) -> (i32, i32) {
    %c0_i32 = arith.constant 0 : i32
    %c0_i32_0 = arith.constant 0 : i32
    %c0_i32_1 = arith.constant 0 : i32
    return %c0_i32, %c0_i32_0 : i32, i32
  }
  func.func @transform_4(%arg0: i32, %arg1: i32) -> (i32, i32, i32) {
    %c0_i32 = arith.constant 0 : i32
    %c0_i32_0 = arith.constant 0 : i32
    %c0_i32_1 = arith.constant 0 : i32
    %c0_i32_2 = arith.constant 0 : i32
    return %c0_i32, %c0_i32_0, %c0_i32_1 : i32, i32, i32
  }
  func.func @transform_5(%arg0: i32, %arg1: i32) -> (i32, i32) {
    %c0_i32 = arith.constant 0 : i32
    %c0_i32_0 = arith.constant 0 : i32
    %c0_i32_1 = arith.constant 0 : i32
    return %c0_i32, %c0_i32_0 : i32, i32
  }
  func.func @transform_6(%arg0: i32, %arg1: i32) -> (i32, i32) {
    %c0_i32 = arith.constant 0 : i32
    %c0_i32_0 = arith.constant 0 : i32
    %c0_i32_1 = arith.constant 0 : i32
    return %c0_i32, %c0_i32_0 : i32, i32
  }
  func.func @transform_7(%arg0: i32, %arg1: i32) -> (i32, i32) {
    %c0_i32 = arith.constant 0 : i32
    %c0_i32_0 = arith.constant 0 : i32
    %c0_i32_1 = arith.constant 0 : i32
    return %c0_i32, %c0_i32_0 : i32, i32
  }
  func.func @transform_8(%arg0: i32, %arg1: i32) -> (i32, i32, i32, i32) {
    %c0_i32 = arith.constant 0 : i32
    %c0_i32_0 = arith.constant 0 : i32
    %c0_i32_1 = arith.constant 0 : i32
    return %arg0, %arg1, %c0_i32, %c0_i32_0 : i32, i32, i32, i32
  }
}

</mosaic_0001>

<bundles_post_ra>
// kernel: tpu_custom_call.1
= control target key start
LH: loop header
LB: loop body
LE: loop exit
PB: predicated region body
PF: predicated region fallthrough
CT: control target
= control target key end

     0   :  { %s4780_s0 = inlined_call_operand.hbm [shape: bf16[2,8,8,512], index: 0, kind: input, shape index: {}]   ;;  %s4781_s1 = inlined_call_operand.hbm [shape: bf16[2,8,8,512], index: 1, kind: input, shape index: {}]   ;;  %s4782_s2 = inlined_call_operand.hbm [shape: bf16[128,128], index: 2, kind: input, shape index: {}]   ;;  %s4783_s3 = inlined_call_operand.vmem [shape: f32[1,128], index: 3, kind: input, shape index: {}]   ;;  %s4784_s4 = inlined_call_operand.hbm [shape: bf16[9,128,128], index: 4, kind: input, shape index: {}]   ;;  %s4785_s5 = inlined_call_operand.vmem [shape: f32[1,128], index: 5, kind: input, shape index: {}]   ;;  %s4786_s6 = inlined_call_operand.hbm [shape: bf16[128,128], index: 6, kind: input, shape index: {}]   ;;  %s4787_s7 = inlined_call_operand.vmem [shape: f32[1,128], index: 7, kind: input, shape index: {}]   ;;  %s4788_s8 = inlined_call_operand.hbm [shape: bf16[2,8,8,128], index: 8, kind: output, shape index: {}]  }
   0x1   :  { %4802 = sst [smem:[#allocation27_spill]] %s4780_s0 }
   0x2   :  { %4803 = sst [smem:[#allocation28_spill]] %s4782_s2 }
   0x3   :  { %4804 = sst [smem:[#allocation29_spill]] %s4783_s3 }
   0x4   :  { %4805 = sst [smem:[#allocation30_spill]] %s4784_s4 }
   0x5   :  { %4806 = sst [smem:[#allocation31_spill]] %s4785_s5 }
   0x6   :  { %4807 = sst [smem:[#allocation32_spill]] %s4786_s6 }
   0x7   :  { %4808 = sst [smem:[#allocation33_spill]] %s4787_s7 }
   0x8   :  { %4809 = sst [smem:[#allocation34_spill]] %s4788_s8 }
   0x9   :  { %13 = vsyncpa [#allocation7], 0 }
   0xa   :  { %15 = vsyncpa [#allocation7 + $0x1], 0 }
   0xb   :  { %16 = vsyncpa [#allocation10], 0 }
   0xc   :  { %18 = vsyncpa [#allocation10 + $0x1], 0 }
   0xd   :  { %19 = vsyncpa [#allocation13], 0 }
   0xe   :  { %20 = vsyncpa [#allocation8], 0 }
   0xf   :  { %22 = vsyncpa [#allocation8 + $0x1], 0  ;;  %s4179_s27 = smov 0   ;;  %s4181_s28 = smov 0  }
  0x10   :  { %s4183_s29 = smov 0   ;;  %s4185_s30 = smov 0  }
  0x11   :  { %s4187_s9 = smov 0   ;;  %s4189_s10 = smov 0  }
  0x12   :  { %s4191_s11 = smov 0   ;;  %s4193_s12 = smov 0  }
  0x13   :  { %s4195_s13 = smov 0   ;;  %s4197_s14 = smov 0  }
  0x14   :  { %s4199_s15 = smov 0  }
  0x15 LB: > { %4810 = sst [smem:[#allocation21_spill]] %s4089_s30  ;;  %s4235_s16 = sadd.s32 4294967295, %s4117_s15   ;;  %s4117_s15 = sphi %s4199_s15, %s28_s15   ;;  %s4113_s14 = sphi %s4197_s14, %s4872_s14   ;;  %s4109_s13 = sphi %s4195_s13, %s4871_s13   ;;  %s4105_s12 = sphi %s4193_s12, %s4870_s12   ;;  %s4101_s11 = sphi %s4191_s11, %s4869_s11   ;;  %s4097_s10 = sphi %s4189_s10, %s4868_s10   ;;  %s4093_s9 = sphi %s4187_s9, %s4867_s9   ;;  %s4089_s30 = sphi %s4185_s30, %s4866_s30   ;;  %s4085_s29 = sphi %s4183_s29, %s4865_s29   ;;  %s4081_s28 = sphi %s4181_s28, %s4864_s28   ;;  %s4077_s27 = sphi %s4179_s27, %s4863_s27  }
  0x16   : > { %4811 = sst [smem:[#allocation22_spill]] %s4101_s11  ;;  %s2852_s17 = sadd.s32 4294967294, %s4117_s15  }
  0x17   : > { %4812 = sst [smem:[#allocation23_spill]] %s4105_s12  ;;  %p62_p0 = scmp.ne.s32.totalorder %s4093_s9, %s4089_s30 }
  0x18   : > { %p4792_p1 = scmp.eq.s32.totalorder %s4235_s16, 0  ;;  %p256_p3 = scmp.eq.s32.totalorder %s2852_s17, 3 }
  0x19   : > { %p2857_p5 = scmp.ge.s32.totalorder %s4117_s15, 1  ;;  %p263_p7 = scmp.lt.s32.totalorder %s4117_s15, 5 }
  0x1a   : > { %p4244_p4 = por %p4792_p1, %p62_p0  ;;  %p4249_p6 = por %p256_p3, %p62_p0 }
  0x1b   : > { %p4254_p8 = pnand %p2857_p5, %p263_p7  ;;  %s4119_s21 = smov [#allocation11]  }
  0x1c   : > { %s4813_s18 = scalar_select %p4244_p4, 1, 0 }
  0x1d   : > { %s4815_s19 = scalar_select %p4249_p6, 1, 0 }
  0x1e   : > { %4814 = sst [smem:[#allocation24_spill]] %s4813_s18  ;;  %s275_s22 = sshll.u32 %s4119_s21, 4  ;;  %s4258_s22 = int_to_ptr.vmem [resolvable:$true] %s275_s22 }
  0x1f   : > { %4816 = sst [smem:[#allocation25_spill]] %s4815_s19  ;;  %p3589_p9 = pneg %p4254_p8 }
  0x20   : > { %s4817_s20 = scalar_select %p4254_p8, 1, 0 }
  0x21   : > { %p4264_p10 = pnand %p3589_p9, %p4792_p1  ;;  %s4120_s24 = smov [#allocation12]  }
  0x22   : > { %s291_s25 = sshll.u32 %s4120_s24, 4  ;;  %s4121_s26 = smov [#allocation14]   ;;  %s4268_s25 = int_to_ptr.vmem [resolvable:$true] %s291_s25 }
  0x23   : > { %s4270_s17 = sshll.u32 %s4121_s26, 4  ;;  %s4819_s2 = sld [smem:[#allocation28_spill]]  ;;  %s308_s17 = int_to_ptr.vmem [resolvable:$true] %s4270_s17 }
  0x24   : > { %p4280_p12 = pneg %p4264_p10 }
  0x29   : > { %s3839_s21 = scalar_lea.hbm %s4819_s2, 1024 }
  0x2a   : > { %p3840_p11 = scmp.ne.s32.totalorder %s4819_s2, %s3839_s21  ;;  %p3846_p3 = scmp.lt.u32.totalorder %s3839_s21, %s4819_s2 }
  0x2c   : > { %p3842_p13 = pnand %p4280_p12, %p3840_p11 }
  0x2e   : > { %p3843_p0 = pneg %p3842_p13 }
  0x30   : > { %p3848_p5 = pnand %p3846_p3, %p3843_p0 }
  0x32   : > { %3851 = shalt.err (!%p3848_p5)
}
  0x33   : > { %s3852_s7 = scalar_lea.vmem %s4258_s22, 1024  ;;  %p3860_p2 = scmp.lt.s32.totalorder %s4258_s22, %s4258_s22 }
  0x34   : > { %p3853_p7 = scmp.ne.s32.totalorder %s4258_s22, %s3852_s7  ;;  %p3861_p6 = scmp.lt.s32.totalorder %s3852_s7, %s3852_s7 }
  0x36   : > { %p3855_p9 = pnand %p3853_p7, %p4280_p12  ;;  %p3862_p11 = por %p3861_p6, %p3860_p2 }
  0x38   : > { %p3856_p1 = pneg %p3855_p9 }
  0x3a   : > { %p3863_p13 = pnand %p3862_p11, %p3856_p1 }
  0x3c   : > { %3866 = shalt.err (!%p3863_p13)
}
  0x3d   : > { %s4122_s8 = smov 64   ;;  %s4123_s30 = smov 4  }
  0x3e   : > { %3592 = dma.hbm_to_vmem [thread:$0]  (!%p4264_p10), %s4819_s2, 1024, %s4258_s22, [#allocation10], %s4122_s8, %s4122_s8, %s4123_s30  }
  0x3f   : > { %s4821_s4 = sld [smem:[#allocation30_spill]] }
  0x45   : > { %s3867_s7 = scalar_lea.hbm %s4821_s4, 9216 }
  0x46   : > { %p3868_p1 = scmp.ne.s32.totalorder %s4821_s4, %s3867_s7  ;;  %p3874_p0 = scmp.lt.u32.totalorder %s3867_s7, %s4821_s4 }
  0x48   : > { %p3870_p2 = pnand %p3868_p1, %p4280_p12 }
  0x4a   : > { %p3871_p6 = pneg %p3870_p2 }
  0x4c   : > { %p3876_p3 = pnand %p3874_p0, %p3871_p6 }
  0x4e   : > { %3879 = shalt.err (!%p3876_p3)
}
  0x4f   : > { %s3880_s22 = scalar_lea.vmem %s4268_s25, 9216  ;;  %p3888_p11 = scmp.lt.s32.totalorder %s4268_s25, %s4268_s25 }
  0x50   : > { %p3881_p5 = scmp.ne.s32.totalorder %s4268_s25, %s3880_s22  ;;  %p3889_p13 = scmp.lt.s32.totalorder %s3880_s22, %s3880_s22 }
  0x52   : > { %p3883_p7 = pnand %p3881_p5, %p4280_p12  ;;  %p3890_p1 = por %p3889_p13, %p3888_p11 }
  0x54   : > { %p3884_p9 = pneg %p3883_p7 }
  0x56   : > { %p3891_p2 = pnand %p3890_p1, %p3884_p9 }
  0x58   : > { %3894 = shalt.err (!%p3891_p2)
}
  0x59   : > { %3595 = dma.hbm_to_vmem [thread:$0]  (!%p4264_p10), %s4821_s4, 9216, %s4268_s25, [#allocation13], %s4122_s8, %s4122_s8, %s4123_s30  }
  0x5a   : > { %s4822_s6 = sld [smem:[#allocation32_spill]] }
  0x60   : > { %s3895_s19 = scalar_lea.hbm %s4822_s6, 1024 }
  0x61   : > { %p3896_p6 = scmp.ne.s32.totalorder %s4822_s6, %s3895_s19  ;;  %p3902_p5 = scmp.lt.u32.totalorder %s3895_s19, %s4822_s6 }
  0x63   : > { %p3898_p0 = pnand %p3896_p6, %p4280_p12 }
  0x65   : > { %p3899_p3 = pneg %p3898_p0 }
  0x67   : > { %p3904_p7 = pnand %p3902_p5, %p3899_p3 }
  0x69   : > { %3907 = shalt.err (!%p3904_p7)
}
  0x6a   : > { %s3908_s22 = scalar_lea.vmem %s308_s17, 1024  ;;  %p3916_p1 = scmp.lt.s32.totalorder %s308_s17, %s308_s17 }
  0x6b   : > { %p3909_p9 = scmp.ne.s32.totalorder %s308_s17, %s3908_s22  ;;  %p3917_p2 = scmp.lt.s32.totalorder %s3908_s22, %s3908_s22 }
  0x6d   : > { %p3911_p11 = pnand %p3909_p9, %p4280_p12  ;;  %p3918_p4 = por %p3917_p2, %p3916_p1 }
  0x6f   : > { %p3912_p13 = pneg %p3911_p11 }
  0x71   : > { %p3919_p8 = pnand %p3918_p4, %p3912_p13 }
  0x73   : > { %3922 = shalt.err (!%p3919_p8)
}
  0x74   : > { %3598 = dma.hbm_to_vmem [thread:$0]  (!%p4264_p10), %s4822_s6, 1024, %s308_s17, [#allocation13], %s4122_s8, %s4122_s8, %s4123_s30  }
  0x75   : > { %s40_s12 = sadd.s32 1, %s4113_s14  ;;  %s49_s23 = sadd.s32 1, %s4097_s10 }
  0x76   : > { %p56_p4 = scmp.ne.s32.totalorder %s4097_s10, %s4093_s9  ;;  %p4798_p8 = scmp.eq.s32.totalorder %s4117_s15, 0 }
  0x77   : > { %p4797_p12 = scmp.lt.s32.totalorder %s4117_s15, 4  ;;  %p4823_p6 = scmp.eq.s32.totalorder %s4235_s16, 3 }
  0x78   : > { %s324_s11 = sand.u32 1, %s4097_s10   ;;  %p58_p3 = por %p4798_p8, %p56_p4 }
  0x79   : > { %p4360_p0 = por %p4823_p6, %p56_p4  ;;  %s2862_s18 = sshll.u32 %s324_s11, 6 }
  0x7a   : > { %s3023_s19 = sshll.u32 %s4109_s13, 4  ;;  %s4799_s21 = sshll.u32 %s4113_s14, 5 }
  0x7b   : > { %s4824_s5 = scalar_select %p4360_p0, 1, 0 }
  0x7c   : > { %s335_s24 = sadd.s32 %s3023_s19, %s4799_s21  ;;  %s328_s17 = scalar_lea.vmem [#allocation6], %s2862_s18 }
  0x7d   : > { %s338_s8 = sshll.u32 %s328_s17, 4  ;;  %s2866_s30 = sshll.u32 %s335_s24, 6  ;;  %s4371_s8 = int_to_ptr.vmem [resolvable:$true] %s338_s8 }
  0x7e   : > { %s4825_s0 = sld [smem:[#allocation27_spill]]  ;;  %p4380_p10 = pnand %p4797_p12, %p58_p3 }
  0x7f   : > { %s4384_s3 = scalar_lea.sflag [#allocation7], %s324_s11 }
  0x80   : > { %p3925_p7 = pneg %p4380_p10 }
  0x84   : > { %s4376_s22 = scalar_lea.hbm %s4825_s0, %s2866_s30  ;;  %s3928_s17 = scalar_lea.hbm %s4825_s0, 4096 }
  0x85   : > { %s3923_s18 = scalar_lea.hbm %s4376_s22, 1024  ;;  %p3929_p13 = scmp.lt.u32.totalorder %s4376_s22, %s4825_s0 }
  0x86   : > { %p3924_p5 = scmp.ne.s32.totalorder %s4376_s22, %s3923_s18  ;;  %p3930_p1 = scmp.lt.u32.totalorder %s3928_s17, %s3923_s18 }
  0x87   : > { %p3932_p4 = scmp.lt.u32.totalorder %s3923_s18, %s4376_s22 }
  0x88   : > { %p3926_p9 = pnand %p3925_p7, %p3924_p5  ;;  %p3931_p2 = por %p3930_p1, %p3929_p13 }
  0x8a   : > { %p3927_p11 = pneg %p3926_p9  ;;  %p3933_p6 = por %p3932_p4, %p3931_p2 }
  0x8c   : > { %p3934_p3 = pnand %p3933_p6, %p3927_p11 }
  0x8e   : > { %3937 = shalt.err (!%p3934_p3)
}
  0x8f   : > { %s3938_s11 = scalar_lea.vmem %s4371_s8, 1024  ;;  %s4124_s7 = smov [#allocation6]  }
  0x90   : > { %p3939_p5 = scmp.ne.s32.totalorder %s4371_s8, %s3938_s11  ;;  %s3943_s19 = sshll.u32 %s4124_s7, 4  ;;  %s3944_s19 = int_to_ptr.vmem [resolvable:$false] %s3943_s19 }
  0x91   : > { %s3945_s24 = scalar_lea.vmem %s3944_s19, 2048  ;;  %p3946_p8 = scmp.lt.s32.totalorder %s4371_s8, %s3944_s19 }
  0x92   : > { %p3941_p9 = pnand %p3939_p5, %p3925_p7  ;;  %p3947_p13 = scmp.lt.s32.totalorder %s3945_s24, %s3938_s11 }
  0x94   : > { %p3942_p12 = pneg %p3941_p9  ;;  %p3948_p1 = por %p3947_p13, %p3946_p8 }
  0x96   : > { %p3949_p2 = pnand %p3948_p1, %p3942_p12 }
  0x98   : > { %3952 = shalt.err (!%p3949_p2)
}
  0x99   : > { %s4125_s18 = smov 256   ;;  %s4126_s17 = smov 16  }
  0x9a   : > { %3602 = dma.hbm_to_vmem [thread:$0]  (!%p4380_p10), %s4376_s22, 1024, %s4371_s8, %s4384_s3, %s4125_s18, %s4125_s18, %s4126_s17  }
  0x9b   : > { %s37_s30 = sadd.s32 1, %s4109_s13  ;;  %s2853_s26 = sshll.u32 %s4109_s13, 2 }
  0x9c   : > { %p38_p8 = scmp.ge.s32.totalorder %s37_s30, 2  ;;  %s2854_s11 = sadd.s32 4294967295, %s2853_s26 }
  0x9d   : > { %s85_s7 = sadd.s32 1, %s4085_s29  ;;  %p74_p12 = scmp.gt.s32.totalorder %s2854_s11, 0 }
  0x9e   : > { %s4874_s30 = smov (%p38_p8, %s37_s30), 0  ;;  %s4876_s12 = smov (!%p38_p8, %s40_s12), %s4113_s14 }
  0x9f   : > { %s45_s25 = ssub.s32 %s4109_s13, %s4874_s30  ;;  %p42_p10 = scmp.ge.s32.totalorder %s4876_s12, 2 }
  0xa0   : > { %s2855_s8 = sshll.u32 %s4874_s30, 2  ;;  %s4878_s11 = smov (!%p74_p12, %s2854_s11), 0 }
  0xa1   : > { %s4880_s12 = smov (%p42_p10, %s4876_s12), 0  ;;  %s2856_s22 = sadd.s32 4294967295, %s2855_s8 }
  0xa2   : > { %4827 = sst [smem:[#allocation26_spill]] %s4880_s12  ;;  %p92_p7 = scmp.ne.s32.totalorder %s4085_s29, %s4081_s28 }
  0xa3   : > { %s44_s3 = ssub.s32 %s4113_s14, %s4880_s12  ;;  %p78_p11 = scmp.gt.s32.totalorder %s2856_s22, 0 }
  0xa4   : > { %s46_s19 = sor.u32 %s45_s25, %s44_s3  ;;  %p4828_p4 = scmp.eq.s32.totalorder %s4117_s15, 0 }
  0xa5   : > { %p47_p3 = scmp.eq.s32.totalorder %s46_s19, 0  ;;  %p98_p5 = scmp.ne.s32.totalorder %s4081_s28, %s4077_s27 }
  0xa6   : > { %p4431_p6 = por %p92_p7, %p4828_p4  ;;  %s4882_s22 = smov (!%p78_p11, %s2856_s22), 0 }
  0xa7   : > { %s4440_s18 = scalar_select %p47_p3, %s4097_s10, %s49_s23  }
  0xa8   : > { %s81_s17 = ssub.s32 %s4878_s11, %s4882_s22  ;;  %p4830_p9 = scmp.eq.s32.totalorder %s4235_s16, 0 }
  0xa9   : > { %s82_s25 = sor.u32 %s81_s17, %s44_s3  ;;  %s348_s8 = sand.u32 1, %s4117_s15  }
  0xaa   : > { %p4444_p13 = por %p98_p5, %p4830_p9  ;;  %p83_p1 = scmp.eq.s32.totalorder %s82_s25, 0 }
  0xab   : > { %s350_s21 = sand.u32 1, %s4085_s29   ;;  %s2870_s0 = sshll.u32 %s4878_s11, 2 }
  0xac   : > { %s4451_s2 = scalar_select %p83_p1, %s4085_s29, %s85_s7  }
  0xad   : > { %s2867_s27 = sshll.u32 %s350_s21, 4  ;;  %s4832_s19 = sshll.u32 %s4113_s14, 5 }
  0xae   : > { %s362_s4 = sadd.s32 %s2870_s0, %s4832_s19  ;;  %s352_s3 = scalar_lea.vmem [#allocation9], %s2867_s27 }
  0xaf   : > { %s2872_s23 = sshll.u32 %s362_s4, 6  ;;  %s366_s17 = sshll.u32 %s352_s3, 4  ;;  %s4460_s17 = int_to_ptr.vmem [resolvable:$true] %s366_s17 }
  0xb0   : > { %s4458_s22 = scalar_lea.hbm %s4781_s1, %s2872_s23  ;;  %p4833_p2 = scmp.lt.s32.totalorder %s4117_s15, 4 }
  0xb1   : > { %s349_s0 = scalar_lea.sflag [#allocation10], %s348_s8  ;;  %s3953_s4 = scalar_lea.hbm %s4458_s22, 256 }
  0xb2   : > { %p4466_p8 = pnand %p4833_p2, %p4431_p6  ;;  %p3954_p12 = scmp.ne.s32.totalorder %s4458_s22, %s3953_s4 }
  0xb3   : > { %s3958_s11 = scalar_lea.hbm %s4781_s1, 4096  ;;  %p3959_p4 = scmp.lt.u32.totalorder %s4458_s22, %s4781_s1 }
  0xb4   : > { %p3955_p10 = pneg %p4466_p8  ;;  %p3960_p6 = scmp.lt.u32.totalorder %s3958_s11, %s3953_s4 }
  0xb5   : > { %p3962_p5 = scmp.lt.u32.totalorder %s3953_s4, %s4458_s22 }
  0xb6   : > { %p3956_p7 = pnand %p3955_p10, %p3954_p12  ;;  %p3961_p3 = por %p3960_p6, %p3959_p4 }
  0xb8   : > { %p3957_p11 = pneg %p3956_p7  ;;  %p3963_p9 = por %p3962_p5, %p3961_p3 }
  0xba   : > { %p3964_p1 = pnand %p3963_p9, %p3957_p11 }
  0xbc   : > { %3967 = shalt.err (!%p3964_p1)
}
  0xbd   : > { %s3968_s25 = scalar_lea.vmem %s4460_s17, 256  ;;  %s4127_s8 = smov [#allocation9]  }
  0xbe   : > { %p3969_p2 = scmp.ne.s32.totalorder %s4460_s17, %s3968_s25  ;;  %s3973_s27 = sshll.u32 %s4127_s8, 4  ;;  %s3974_s27 = int_to_ptr.vmem [resolvable:$false] %s3973_s27 }
  0xbf   : > { %s3975_s19 = scalar_lea.vmem %s3974_s27, 512  ;;  %p3976_p0 = scmp.lt.s32.totalorder %s4460_s17, %s3974_s27 }
  0xc0   : > { %p3971_p12 = pnand %p3969_p2, %p3955_p10  ;;  %p3977_p4 = scmp.lt.s32.totalorder %s3975_s19, %s3968_s25 }
  0xc2   : > { %p3972_p7 = pneg %p3971_p12  ;;  %p3978_p6 = por %p3977_p4, %p3976_p0 }
  0xc4   : > { %p3979_p3 = pnand %p3978_p6, %p3972_p7 }
  0xc6   : > { %3982 = shalt.err (!%p3979_p3)
}
  0xc7   : > { %3605 = dma.hbm_to_vmem [thread:$0]  (!%p4466_p8), %s4458_s22, 256, %s4460_s17, %s349_s0  }
  0xc8   : > { %p4835_p11 = scmp.ne.s32.totalorder %s4817_s20, 0 }
  0xc9   : > { %s4836_s23 = sld [smem:[#allocation24_spill]] (!%p4835_p11)  ;;  %s4498_s3 = sand.u32 (!%p4835_p11), 1, %s4093_s9  }
  0xca   : > { %375 = sbr.rel (%p4835_p11) target bundleno = 1380 (0x564), region = 52  ;;  %s2874_s4 = sshll.u32 (!%p4835_p11), %s4498_s3, 6 }
  0xcb   : > { %s378_s6 = scalar_lea.sflag (!%p4835_p11), [#allocation7], %s4498_s3  ;;  %s4502_s12 = scalar_lea.vmem (!%p4835_p11), [#allocation6], %s2874_s4 }
  0xcf   : > { %p4837_p0 = scmp.ne.s32.totalorder (!%p4835_p11), %s4836_s23, 0 }
  0xd1   : > { %4056 = dma.done.wait (%p4837_p0), %s378_s6, 1024  }
  0xd2   : > { %4058 = vsyncadd (%p4837_p0), %s378_s6, 4294966272  ;;  %s386_s20 = sand.u32 1, %s4235_s16   ;;  %s388_s22 = sand.u32 1, %s4081_s28  }
  0xd3   : > { %s4510_s17 = sshll.u32 %s388_s22, 4  ;;  %s387_s21 = scalar_lea.sflag [#allocation10], %s386_s20 }
  0xd4   : > { %s390_s0 = scalar_lea.vmem [#allocation9], %s4510_s17 }
  0xd5   : > { %4060 = dma.done.wait (%p4444_p13), %s387_s21, 256  }
  0xd6   : > { %4062 = vsyncadd (%p4444_p13), %s387_s21, 4294967040  ;;  %p4838_p8 = scmp.eq.s32.totalorder %s4235_s16, 0 }
  0xd8   : > { %4064 = dma.done.wait (%p4838_p8), [#allocation10], 1024   ;;  %p4839_p10 = pmov %p4838_p8 }
  0xd9   : > { %p4840_p5 = pmov %p4838_p8 }
  0xda   : > { %4066 = vsyncadd (%p4839_p10), [#allocation10], 4294966272 }
  0xdb   : > { %4068 = dma.done.wait (%p4840_p5), [#allocation13], 10240   ;;  %p4841_p9 = pmov %p4840_p5 }
  0xdc   : > { %s2879_s11 = sshll.u32 %s4498_s3, 4  ;;  %v4128_v0 = vmov 0   ;;  %v4526_v1 = vld [vmem:[#allocation11] sm:$0xff]   ;;  %v4528_v2 = vld [vmem:[#allocation11 + $0x8] sm:$0xff]   ;;  %v4536_v3 = vld [vmem:[#allocation11 + $0x10] sm:$0xff]   ;;  %vm449_vm0 = vcmask 1040384  }
  0xdd   : > { %4070 = vsyncadd (%p4841_p9), [#allocation13], 4294957056  ;;  %447 = vst [vmem:[#allocation2] sm:$0xf] %v4128_v0  ;;  %3239 = vmatprep.subr.bf16.mxu1 %v4526_v1  ;;  %3219 = vmatprep.subr.bf16.mxu0 %v4526_v1  ;;  %v4540_v4 = vld [vmem:[#allocation11 + $0x18] sm:$0xff]   ;;  %v3722_v7 = vld [vmem:[#allocation11 + $0x20] sm:$0xff]  }
  0xde   : > { %448 = vst [vmem:[#allocation3] sm:$0xf] %v4128_v0  ;;  %3240 = vmatpush3.bf16.msra.mxu1 %v4526_v1  ;;  %3220 = vmatpush3.bf16.msra.mxu0 %v4526_v1  ;;  %v3726_v5 = vld [vmem:[%s4502_s12 + $0x4] ss:$16 sps:$4 sm:$0xff]   ;;  %vm450_vm1 = vsmask.f32 256 }
  0xdf   : > { %3241 = vmatprep.subr.bf16.mxu1 %v4528_v2  ;;  %3221 = vmatprep.subr.bf16.mxu0 %v4528_v2  ;;  %v3730_v6 = vld [vmem:[%s4502_s12] ss:$16 sps:$4 sm:$0xff]   ;;  %vm4550_vm2 = vmand %vm449_vm0, %vm450_vm1  ;;  %v452_v9 = vld [vmem:[#allocation3 + $0x4] sm:$0x1]  ;;  %s4844_s7 = sld [smem:[#allocation29_spill]]  ;;  %vm877_vm3 = vcmask 1043456  }
  0xe0   : > { %3255 = vmatprep.mubr.bf16.mxu1 %v3726_v5  ;;  %3235 = vmatprep.mubr.bf16.mxu0 %v3730_v6  ;;  %v453_v11 = vsel %vm4550_vm2, 0, %v452_v9  ;;  %v476_v13 = vld [vmem:[#allocation5 + $0x10] sm:$0x1]  ;;  %v3723_v15 = vld [vmem:[#allocation11 + $0x28] sm:$0xff]   ;;  %v3725_v17 = vld [vmem:[#allocation11 + $0x38] sm:$0xff]   ;;  %s4659_s24 = scalar_lea.vmem [#allocation15], %s2879_s11 }
  0xe1   : > { %454 = vst [vmem:[#allocation3 + $0x4] sm:$0x1] %v453_v11  ;;  %v477_v14 = vsel %vm4550_vm2, 0, %v476_v13  ;;  %v3724_v16 = vld [vmem:[#allocation11 + $0x30] sm:$0xff]   ;;  %v3732_v20 = vld [vmem:[%s4502_s12 + $0xc] ss:$16 sps:$4 sm:$0xff]  }
  0xe2   : > { %3242 = vmatpush3.bf16.msra.mxu1 %v4528_v2  ;;  %3222 = vmatpush3.bf16.msra.mxu0 %v4528_v2  ;;  %478 = vst [vmem:[#allocation5 + $0x10] sm:$0x1] %v477_v14  ;;  %v3728_v18 = vld [vmem:[%s4502_s12 + $0x24] ss:$16 sps:$4 sm:$0xff]   ;;  %v3731_v19 = vld [vmem:[%s4502_s12 + $0x20] ss:$16 sps:$4 sm:$0xff]  }
  0xe3   : > { %3243 = vmatprep.subr.bf16.mxu1 %v4536_v3  ;;  %3223 = vmatprep.subr.bf16.mxu0 %v4536_v3  ;;  %v3736_v21 = vld [vmem:[%s4502_s12 + $0x8] ss:$16 sps:$4 sm:$0xff]   ;;  %v3734_v22 = vld [vmem:[%s4502_s12 + $0x2c] ss:$16 sps:$4 sm:$0xff]   ;;  %v470_v24 = vld [vmem:[#allocation5] sm:$0x1] }
  0xe4   : > { %v3737_v23 = vld [vmem:[%s4502_s12 + $0x28] ss:$16 sps:$4 sm:$0xff]   ;;  %v471_v25 = vsel %vm4550_vm2, 0, %v470_v24  ;;  %v464_v30 = vld [vmem:[#allocation3 + $0x18] sm:$0x1]  ;;  %s4847_s25 = sld [smem:[#allocation22_spill]] }
  0xe5   : > { %v455_v10 = vld [vmem:[#allocation3] sm:$0x1]  ;;  %v479_v26 = vld [vmem:[#allocation5 + $0x18] sm:$0x1]  ;;  %472 = vst [vmem:[#allocation5] sm:$0x1] %v471_v25 }
  0xe6   : > { %3244 = vmatpush3.bf16.msra.mxu1 %v4536_v3  ;;  %3224 = vmatpush3.bf16.msra.mxu0 %v4536_v3  ;;  %v456_v12 = vsel %vm4550_vm2, 0, %v455_v10  ;;  %v480_v27 = vsel %vm4550_vm2, 0, %v479_v26  ;;  %v473_v28 = vld [vmem:[#allocation5 + $0x8] sm:$0x1]  ;;  %v465_v31 = vsel %vm4550_vm2, 0, %v464_v30 }
  0xe7   : > { %3245 = vmatprep.subr.bf16.mxu1 %v4540_v4  ;;  %3225 = vmatprep.subr.bf16.mxu0 %v4540_v4  ;;  %457 = vst [vmem:[#allocation3] sm:$0x1] %v456_v12  ;;  %481 = vst [vmem:[#allocation5 + $0x18] sm:$0x1] %v480_v27  ;;  %v474_v29 = vsel %vm4550_vm2, 0, %v473_v28 }
  0xe8   : > { %475 = vst [vmem:[#allocation5 + $0x8] sm:$0x1] %v474_v29  ;;  %466 = vst [vmem:[#allocation3 + $0x18] sm:$0x1] %v465_v31  ;;  %v458_v32 = vld [vmem:[#allocation3 + $0x8] sm:$0x1] }
  0xe9   : > { %v459_v33 = vsel %vm4550_vm2, 0, %v458_v32  ;;  %v467_v34 = vld [vmem:[#allocation3 + $0x20] sm:$0x1]  ;;  %v461_v36 = vld [vmem:[#allocation3 + $0x10] sm:$0x1] }
  0xea   : > { %3246 = vmatpush3.bf16.msra.mxu1 %v4540_v4  ;;  %3226 = vmatpush3.bf16.msra.mxu0 %v4540_v4  ;;  %460 = vst [vmem:[#allocation3 + $0x8] sm:$0x1] %v459_v33  ;;  %v468_v35 = vsel %vm4550_vm2, 0, %v467_v34  ;;  %v462_v37 = vsel %vm4550_vm2, 0, %v461_v36  ;;  %v4601_v38 = vld [vmem:[%s4844_s7] ss:$0 sm:$0xff] }
  0xeb   : > { %3247 = vmatprep.subr.bf16.mxu1 %v3722_v7  ;;  %3227 = vmatprep.subr.bf16.mxu0 %v3722_v7  ;;  %469 = vst [vmem:[#allocation3 + $0x20] sm:$0x1] %v468_v35  ;;  %463 = vst [vmem:[#allocation3 + $0x10] sm:$0x1] %v462_v37  ;;  %vm878_vm4 = vsmask.f32 7938 }
  0xec   : > { %v892_v5 = vld [vmem:[#allocation5 + $0x10] sm:$0xf]  ;;  %v895_v11 = vld [vmem:[#allocation5 + $0x14] sm:$0x1]  ;;  %v880_v12 = vld [vmem:[#allocation5] sm:$0xf] }
  0xed   : > { %vm4613_vm5 = vmand %vm877_vm3, %vm878_vm4  ;;  %v901_v26 = vld [vmem:[#allocation5 + $0x1c] sm:$0x1]  ;;  %v889_v34 = vld [vmem:[#allocation5 + $0xc] sm:$0x1]  ;;  %p2905_p13 = scmp.le.s32.totalorder %s4847_s25, 0 }
  0xee   : > { %3248 = vmatpush3.bf16.msra.mxu1 %v3722_v7  ;;  %3228 = vmatpush3.bf16.msra.mxu0 %v3722_v7  ;;  %vm4130_vm6 = vmmov (!%p2905_p13), 0   ;;  %s4848_s19 = sld [smem:[#allocation29_spill]] (!%p2905_p13) }
  0xef   : > { %3249 = vmatprep.subr.bf16.mxu1 %v3723_v15  ;;  %3229 = vmatprep.subr.bf16.mxu0 %v3723_v15  ;;  %v886_v33 = vld [vmem:[#allocation5 + $0x8] sm:$0xf] }
  0xf2   : > { %3250 = vmatpush3.bf16.msra.mxu1 %v3723_v15  ;;  %3230 = vmatpush3.bf16.msra.mxu0 %v3723_v15 }
  0xf3   : > { %3251 = vmatprep.subr.bf16.mxu1 %v3724_v16  ;;  %3231 = vmatprep.subr.bf16.mxu0 %v3724_v16 }
  0xf6   : > { %3252 = vmatpush3.bf16.msra.mxu1 %v3724_v16  ;;  %3232 = vmatpush3.bf16.msra.mxu0 %v3724_v16 }
  0xf7   : > { %3253 = vmatprep.subr.bf16.mxu1 %v3725_v17  ;;  %3233 = vmatprep.subr.bf16.mxu0 %v3725_v17 }
  0xfa   : > { %3254 = vmatpush3.bf16.msra.mxu1 %v3725_v17  ;;  %3234 = vmatpush3.bf16.msra.mxu0 %v3725_v17 }
  0xfb   : > { %3279 = vmatprep.subr.bf16.mxu1 %v4526_v1  ;;  %3259 = vmatprep.subr.bf16.mxu0 %v4526_v1 }
  0xfd   : > { %3256 = vmatmul.mubr.bf16.vlgmr.msra.gmra.mrb[0].mxu1 %v3728_v18  ;;  %3236 = vmatmul.mubr.bf16.vlgmr.msra.gmra.mrb[0].mxu0 %v3731_v19 }
  0xfe   : > { %3280 = vmatpush3.bf16.msra.mxu1 %v4526_v1  ;;  %3260 = vmatpush3.bf16.msra.mxu0 %v4526_v1 }
  0xff   : > { %3281 = vmatprep.subr.bf16.mxu1 %v4528_v2  ;;  %3261 = vmatprep.subr.bf16.mxu0 %v4528_v2 }
 0x100   : > { %3295 = vmatprep.mubr.bf16.mxu1 %v3732_v20  ;;  %3275 = vmatprep.mubr.bf16.mxu0 %v3736_v21 }
 0x102   : > { %3282 = vmatpush3.bf16.msra.mxu1 %v4528_v2  ;;  %3262 = vmatpush3.bf16.msra.mxu0 %v4528_v2 }
 0x103   : > { %3283 = vmatprep.subr.bf16.mxu1 %v4536_v3  ;;  %3263 = vmatprep.subr.bf16.mxu0 %v4536_v3 }
 0x106   : > { %3284 = vmatpush3.bf16.msra.mxu1 %v4536_v3  ;;  %3264 = vmatpush3.bf16.msra.mxu0 %v4536_v3 }
 0x107   : > { %3285 = vmatprep.subr.bf16.mxu1 %v4540_v4  ;;  %3265 = vmatprep.subr.bf16.mxu0 %v4540_v4 }
 0x10a   : > { %3286 = vmatpush3.bf16.msra.mxu1 %v4540_v4  ;;  %3266 = vmatpush3.bf16.msra.mxu0 %v4540_v4 }
 0x10b   : > { %3287 = vmatprep.subr.bf16.mxu1 %v3722_v7  ;;  %3267 = vmatprep.subr.bf16.mxu0 %v3722_v7 }
 0x10e   : > { %3288 = vmatpush3.bf16.msra.mxu1 %v3722_v7  ;;  %3268 = vmatpush3.bf16.msra.mxu0 %v3722_v7 }
 0x10f   : > { %3289 = vmatprep.subr.bf16.mxu1 %v3723_v15  ;;  %3269 = vmatprep.subr.bf16.mxu0 %v3723_v15 }
 0x112   : > { %3290 = vmatpush3.bf16.msra.mxu1 %v3723_v15  ;;  %3270 = vmatpush3.bf16.msra.mxu0 %v3723_v15 }
 0x113   : > { %3291 = vmatprep.subr.bf16.mxu1 %v3724_v16  ;;  %3271 = vmatprep.subr.bf16.mxu0 %v3724_v16 }
 0x116   : > { %3292 = vmatpush3.bf16.msra.mxu1 %v3724_v16  ;;  %3272 = vmatpush3.bf16.msra.mxu0 %v3724_v16 }
 0x117   : > { %3293 = vmatprep.subr.bf16.mxu1 %v3725_v17  ;;  %3273 = vmatprep.subr.bf16.mxu0 %v3725_v17 }
 0x11a   : > { %3294 = vmatpush3.bf16.msra.mxu1 %v3725_v17  ;;  %3274 = vmatpush3.bf16.msra.mxu0 %v3725_v17  ;;  %v883_v17 = vld [vmem:[#allocation5 + $0x4] sm:$0x1] }
 0x11d   : > { %3296 = vmatmul.mubr.bf16.vlgmr.msra.gmra.mrb[4].mxu1 %v3734_v22  ;;  %3276 = vmatmul.mubr.bf16.vlgmr.msra.gmra.mrb[4].mxu0 %v3737_v23  ;;  %v898_v23 = vld [vmem:[#allocation5 + $0x18] sm:$0xf] }
 0x1d0   : > { %v3257_v39 = vpop.f32.mrb[0].mxu1  ;;  %v3237_v40 = vpop.f32.mrb[0].mxu0 }
 0x1d1   : > { %v677_v41 = vadd.f32 %v3257_v39, %v4601_v38  ;;  %v668_v42 = vpop.f32.mrb[1].mxu1  ;;  %v616_v43 = vadd.f32 %v3237_v40, %v4601_v38  ;;  %v607_v44 = vpop.f32.mrb[1].mxu0 }
 0x1d2   : > { %v669_v45 = vadd.f32 %v4601_v38, %v668_v42  ;;  %v3258_v46 = vpop.f32.mrb[2].mxu1  ;;  %v608_v47 = vadd.f32 %v4601_v38, %v607_v44  ;;  %v3238_v48 = vpop.f32.mrb[2].mxu0 }
 0x1d3   : > { %v685_v49 = vmax.f32 %v677_v41, 0.0  ;;  %v680_v50 = vadd.f32 %v3258_v46, %v4601_v38  ;;  %v671_v51 = vpop.f32.mrb[3].mxu1  ;;  %v624_v52 = vmax.f32 %v616_v43, 0.0  ;;  %v619_v53 = vadd.f32 %v3238_v48, %v4601_v38  ;;  %v610_v54 = vpop.f32.mrb[3].mxu0 }
 0x1d4   : > { %v683_v55 = vmax.f32 %v669_v45, 0.0  ;;  %v672_v56 = vadd.f32 %v4601_v38, %v671_v51  ;;  %v622_v57 = vmax.f32 %v608_v47, 0.0  ;;  %v611_v58 = vadd.f32 %v4601_v38, %v610_v54 }
 0x1d5   : > { %v3026_v59 = vpack.c.bf16 %v685_v49, %v685_v49  ;;  %v686_v60 = vmax.f32 %v680_v50, 0.0  ;;  %v625_v61 = vmax.f32 %v619_v53, 0.0 }
 0x1d6   : > { %v3024_v62 = vpack.c.bf16 %v683_v55, %v683_v55  ;;  %v684_v63 = vmax.f32 %v672_v56, 0.0  ;;  %v623_v0 = vmax.f32 %v611_v58, 0.0 }
 0x1d7   : > { %v854_v1 = vshrl.u32 %v3026_v59, 16  ;;  %v857_v2 = vshll.u32 %v3026_v59, 16  ;;  %v3027_v3 = vpack.c.bf16 %v686_v60, %v686_v60  ;;  %v3041_v4 = vpack.c.bf16 %v625_v61, %v624_v52 }
 0x1d8   : > { %v838_v6 = vshrl.u32 %v3024_v62, 16  ;;  %v3025_v7 = vpack.c.bf16 %v684_v63, %v684_v63  ;;  %v3036_v9 = vpack.c.bf16 %v623_v0, %v622_v57  ;;  %v841_v16 = vshll.u32 %v3024_v62, 16 }
 0x1d9   : > { %v856_v10 = vrot.slane %v854_v1, 7  ;;  %v862_v13 = vshrl.u32 %v3027_v3, 16  ;;  %3058 = vst [vmem:[#allocation4 + $0x8] sm:$0xff] %v3041_v4   ;;  %v865_v22 = vshll.u32 %v3027_v3, 16 }
 0x1da   : > { %v840_v15 = vrot.slane %v838_v6, 7  ;;  %v846_v18 = vshrl.u32 %v3025_v7, 16  ;;  %3037 = vst [vmem:[#allocation4] sm:$0xff] %v3036_v9   ;;  %v849_v28 = vshll.u32 %v3025_v7, 16 }
 0x1db   : > { %v859_v19 = vor.u32 %v857_v2, %v856_v10  ;;  %v860_v20 = vrot.slane %v856_v10, 4  ;;  %v864_v21 = vrot.slane %v862_v13, 7 }
 0x1dc   : > { %v843_v24 = vor.u32 %v841_v16, %v840_v15  ;;  %v844_v25 = vrot.slane %v840_v15, 4  ;;  %v848_v27 = vrot.slane %v846_v18, 7 }
 0x1dd   : > { %v893_v29 = vsel %vm4613_vm5, %v859_v19, %v892_v5  ;;  %v896_v30 = vsel %vm4550_vm2, %v860_v20, %v895_v11  ;;  %v867_v31 = vor.u32 %v865_v22, %v864_v21  ;;  %v868_v32 = vrot.slane %v864_v21, 4  ;;  %v982_v11 = vld [vmem:[#allocation3 + $0x18] sm:$0xf]  ;;  %v970_v19 = vld [vmem:[#allocation3 + $0x8] sm:$0xf] }
 0x1de   : > { %894 = vst [vmem:[#allocation5 + $0x10] sm:$0xf] %v893_v29  ;;  %897 = vst [vmem:[#allocation5 + $0x14] sm:$0x1] %v896_v30  ;;  %v881_v35 = vsel %vm4613_vm5, %v843_v24, %v880_v12  ;;  %v884_v36 = vsel %vm4550_vm2, %v844_v25, %v883_v17  ;;  %v851_v37 = vor.u32 %v849_v28, %v848_v27  ;;  %v852_v39 = vrot.slane %v848_v27, 4 }
 0x1df   : > { %882 = vst [vmem:[#allocation5] sm:$0xf] %v881_v35  ;;  %885 = vst [vmem:[#allocation5 + $0x4] sm:$0x1] %v884_v36  ;;  %v899_v40 = vsel %vm4613_vm5, %v867_v31, %v898_v23  ;;  %v902_v41 = vsel %vm4550_vm2, %v868_v32, %v901_v26  ;;  %v985_v12 = vld [vmem:[#allocation3 + $0x1c] sm:$0x1] }
 0x1e0   : > { %900 = vst [vmem:[#allocation5 + $0x18] sm:$0xf] %v899_v40  ;;  %903 = vst [vmem:[#allocation5 + $0x1c] sm:$0x1] %v902_v41  ;;  %v887_v42 = vsel %vm4613_vm5, %v851_v37, %v886_v33  ;;  %v890_v43 = vsel %vm4550_vm2, %v852_v39, %v889_v34  ;;  %v973_v22 = vld [vmem:[#allocation3 + $0xc] sm:$0x1] }
 0x1e1   : > { %888 = vst [vmem:[#allocation5 + $0x8] sm:$0xf] %v887_v42  ;;  %891 = vst [vmem:[#allocation5 + $0xc] sm:$0x1] %v890_v43  ;;  %v988_v28 = vld [vmem:[#allocation3 + $0x20] sm:$0xf] }
 0x1e2   : > { %v991_v31 = vld [vmem:[#allocation3 + $0x24] sm:$0x1]  ;;  %v976_v39 = vld [vmem:[#allocation3 + $0x10] sm:$0xf]  ;;  %v979_v40 = vld [vmem:[#allocation3 + $0x14] sm:$0x1] }
 0x1f0   : > { %v3297_v44 = vpop.f32.mrb[4].mxu1  ;;  %v3277_v45 = vpop.f32.mrb[4].mxu0 }
 0x1f1   : > { %v803_v46 = vadd.f32 %v3297_v44, %v4601_v38  ;;  %v794_v47 = vpop.f32.mrb[5].mxu1  ;;  %v742_v48 = vadd.f32 %v3277_v45, %v4601_v38  ;;  %v733_v49 = vpop.f32.mrb[5].mxu0 }
 0x1f2   : > { %v795_v50 = vadd.f32 %v4601_v38, %v794_v47  ;;  %v3298_v51 = vpop.f32.mrb[6].mxu1  ;;  %v734_v52 = vadd.f32 %v4601_v38, %v733_v49  ;;  %v3278_v53 = vpop.f32.mrb[6].mxu0  ;;  %v3738_v49 = vld [vmem:[#allocation11] sm:$0xff] (!%p2905_p13)  }
 0x1f3   : > { %v811_v54 = vmax.f32 %v803_v46, 0.0  ;;  %v806_v55 = vadd.f32 %v3298_v51, %v4601_v38  ;;  %v797_v56 = vpop.f32.mrb[7].mxu1  ;;  %v750_v57 = vmax.f32 %v742_v48, 0.0  ;;  %v745_v58 = vadd.f32 %v3278_v53, %v4601_v38  ;;  %v736_v59 = vpop.f32.mrb[7].mxu0  ;;  %v3739_v51 = vld [vmem:[#allocation11 + $0x8] sm:$0xff] (!%p2905_p13)   ;;  %v3741_v53 = vld [vmem:[#allocation11 + $0x18] sm:$0xff] (!%p2905_p13)  }
 0x1f4   : > { %v809_v60 = vmax.f32 %v795_v50, 0.0  ;;  %v798_v61 = vadd.f32 %v4601_v38, %v797_v56  ;;  %v748_v62 = vmax.f32 %v734_v52, 0.0  ;;  %v737_v63 = vadd.f32 %v4601_v38, %v736_v59  ;;  %v3740_v52 = vld [vmem:[#allocation11 + $0x10] sm:$0xff] (!%p2905_p13)  }
 0x1f5   : > { %v3030_v0 = vpack.c.bf16 %v811_v54, %v811_v54  ;;  %v812_v1 = vmax.f32 %v806_v55, 0.0  ;;  %v751_v2 = vmax.f32 %v745_v58, 0.0  ;;  %v4129_v50 = vmov (!%p2905_p13), 0.0   ;;  %v3742_v54 = vld [vmem:[#allocation11 + $0x20] sm:$0xff] (!%p2905_p13)   ;;  %v3743_v55 = vld [vmem:[#allocation11 + $0x28] sm:$0xff] (!%p2905_p13)   ;;  %v3744_v56 = vld [vmem:[#allocation11 + $0x30] sm:$0xff] (!%p2905_p13)  }
 0x1f6   : > { %v3028_v3 = vpack.c.bf16 %v809_v60, %v809_v60  ;;  %v810_v4 = vmax.f32 %v798_v61, 0.0  ;;  %v904_v5 = vpack.c.bf16 %v748_v62, %v748_v62  ;;  %v749_v6 = vmax.f32 %v737_v63, 0.0  ;;  %3319 = vmatprep.subr.bf16.mxu1 (!%p2905_p13), %v4129_v50  ;;  %3299 = vmatprep.subr.bf16.mxu0 (!%p2905_p13), %v4129_v50  ;;  %v998_v58 = vld [vmem:[%s390_s0 + $0x8] sm:$0xff] (!%p2905_p13)  ;;  %v2906_v60 = vld [vmem:[%s4848_s19] ss:$0 sm:$0xff] (!%p2905_p13) }
 0x1f7   : > { %v946_v7 = vshrl.u32 %v3030_v0, 16  ;;  %v3031_v9 = vpack.c.bf16 %v812_v1, %v812_v1  ;;  %v907_v10 = vpack.c.bf16 %v751_v2, %v751_v2  ;;  %v949_v18 = vshll.u32 %v3030_v0, 16  ;;  %3320 = vmatpush3.bf16.msra.mxu1 (!%p2905_p13), %v3738_v49  ;;  %3300 = vmatpush3.bf16.msra.mxu0 (!%p2905_p13), %v3738_v49 }
 0x1f8   : > { %v930_v13 = vshrl.u32 %v3028_v3, 16  ;;  %v3029_v15 = vpack.c.bf16 %v810_v4, %v810_v4  ;;  %909 = vst [vmem:[#allocation2 + $0x4] sm:$0xf] %v904_v5  ;;  %v3046_v16 = vpack.c.bf16 %v750_v57, %v749_v6  ;;  %v933_v21 = vshll.u32 %v3028_v3, 16  ;;  %3321 = vmatprep.subr.bf16.mxu1 (!%p2905_p13), %v4129_v50  ;;  %3301 = vmatprep.subr.bf16.mxu0 (!%p2905_p13), %v4129_v50  ;;  %v3745_v57 = vld [vmem:[#allocation11 + $0x38] sm:$0xff] (!%p2905_p13)  }
 0x1f9   : > { %v948_v17 = vrot.slane %v946_v7, 7  ;;  %v954_v38 = vshrl.u32 %v3031_v9, 16  ;;  %912 = vst [vmem:[#allocation2 + $0x10] sm:$0xf] %v907_v10  ;;  %v957_v27 = vshll.u32 %v3031_v9, 16  ;;  %3335 = vmatprep.mubr.msk.bf16.mxu1 (!%p2905_p13), %vm4130_vm6, %v4129_v50  ;;  %3315 = vmatprep.mubr.msk.bf16.mxu0 (!%p2905_p13), %vm4130_vm6, %v4129_v50  ;;  %v2915_v59 = vcombine.high (!%p2905_p13), %v998_v58, %v998_v58 }
 0x1fa   : > { %v932_v20 = vrot.slane %v930_v13, 7  ;;  %v938_v23 = vshrl.u32 %v3029_v15, 16  ;;  %3059 = vst [vmem:[#allocation2 + $0x8] sm:$0xff] %v3046_v16   ;;  %v941_v33 = vshll.u32 %v3029_v15, 16  ;;  %v1172_v16 = vld [vmem:[#allocation3] sm:$0xf] (!%p2905_p13) }
 0x1fb   : > { %v951_v24 = vor.u32 %v949_v18, %v948_v17  ;;  %v952_v25 = vrot.slane %v948_v17, 4  ;;  %v956_v26 = vrot.slane %v954_v38, 7  ;;  %997 = sbr.rel (%p2905_p13) target bundleno = 760 (0x2f8), region = 76  ;;  %3322 = vmatpush3.bf16.msra.mxu1 (!%p2905_p13), %v3739_v51  ;;  %3302 = vmatpush3.bf16.msra.mxu0 (!%p2905_p13), %v3739_v51  ;;  %v1175_v17 = vld [vmem:[#allocation3 + $0x4] sm:$0x1] (!%p2905_p13) }
 0x1fc   : > { %v935_v29 = vor.u32 %v933_v21, %v932_v20  ;;  %v936_v30 = vrot.slane %v932_v20, 4  ;;  %v940_v32 = vrot.slane %v938_v23, 7  ;;  %3323 = vmatprep.subr.bf16.mxu1 (!%p2905_p13), %v4129_v50  ;;  %3303 = vmatprep.subr.bf16.mxu0 (!%p2905_p13), %v4129_v50 }
 0x1fd   : > { %v983_v34 = vsel %vm4613_vm5, %v951_v24, %v982_v11  ;;  %v986_v35 = vsel %vm4550_vm2, %v952_v25, %v985_v12  ;;  %v959_v36 = vor.u32 %v957_v27, %v956_v26  ;;  %v960_v37 = vrot.slane %v956_v26, 4 }
 0x1fe   : > { %984 = vst [vmem:[#allocation3 + $0x18] sm:$0xf] %v983_v34  ;;  %987 = vst [vmem:[#allocation3 + $0x1c] sm:$0x1] %v986_v35  ;;  %v971_v41 = vsel %vm4613_vm5, %v935_v29, %v970_v19  ;;  %v974_v42 = vsel %vm4550_vm2, %v936_v30, %v973_v22  ;;  %v943_v43 = vor.u32 %v941_v33, %v940_v32  ;;  %v944_v44 = vrot.slane %v940_v32, 4 }
 0x1ff   : > { %972 = vst [vmem:[#allocation3 + $0x8] sm:$0xf] %v971_v41  ;;  %975 = vst [vmem:[#allocation3 + $0xc] sm:$0x1] %v974_v42  ;;  %v989_v45 = vsel %vm4613_vm5, %v959_v36, %v988_v28  ;;  %v992_v46 = vsel %vm4550_vm2, %v960_v37, %v991_v31  ;;  %3324 = vmatpush3.bf16.msra.mxu1 (!%p2905_p13), %v3740_v52  ;;  %3304 = vmatpush3.bf16.msra.mxu0 (!%p2905_p13), %v3740_v52 }
 0x200   : > { %990 = vst [vmem:[#allocation3 + $0x20] sm:$0xf] %v989_v45  ;;  %993 = vst [vmem:[#allocation3 + $0x24] sm:$0x1] %v992_v46  ;;  %v977_v47 = vsel %vm4613_vm5, %v943_v43, %v976_v39  ;;  %v980_v48 = vsel %vm4550_vm2, %v944_v44, %v979_v40  ;;  %3325 = vmatprep.subr.bf16.mxu1 (!%p2905_p13), %v4129_v50  ;;  %3305 = vmatprep.subr.bf16.mxu0 (!%p2905_p13), %v4129_v50 }
 0x201   : > { %978 = vst [vmem:[#allocation3 + $0x10] sm:$0xf] %v977_v47  ;;  %981 = vst [vmem:[#allocation3 + $0x14] sm:$0x1] %v980_v48 }
 0x203   : > { %3326 = vmatpush3.bf16.msra.mxu1 %v3741_v53  ;;  %3306 = vmatpush3.bf16.msra.mxu0 %v3741_v53 }
 0x204   : > { %3327 = vmatprep.subr.bf16.mxu1 %v4129_v50  ;;  %3307 = vmatprep.subr.bf16.mxu0 %v4129_v50 }
 0x207   : > { %3328 = vmatpush3.bf16.msra.mxu1 %v3742_v54  ;;  %3308 = vmatpush3.bf16.msra.mxu0 %v3742_v54 }
 0x208   : > { %3329 = vmatprep.subr.bf16.mxu1 %v4129_v50  ;;  %3309 = vmatprep.subr.bf16.mxu0 %v4129_v50 }
 0x20b   : > { %3330 = vmatpush3.bf16.msra.mxu1 %v3743_v55  ;;  %3310 = vmatpush3.bf16.msra.mxu0 %v3743_v55 }
 0x20c   : > { %3331 = vmatprep.subr.bf16.mxu1 %v4129_v50  ;;  %3311 = vmatprep.subr.bf16.mxu0 %v4129_v50 }
 0x20f   : > { %3332 = vmatpush3.bf16.msra.mxu1 %v3744_v56  ;;  %3312 = vmatpush3.bf16.msra.mxu0 %v3744_v56 }
 0x210   : > { %3333 = vmatprep.subr.bf16.mxu1 %v4129_v50  ;;  %3313 = vmatprep.subr.bf16.mxu0 %v4129_v50 }
 0x213   : > { %3334 = vmatpush3.bf16.msra.mxu1 %v3745_v57  ;;  %3314 = vmatpush3.bf16.msra.mxu0 %v3745_v57 }
 0x216   : > { %3336 = vmatmul.mubr.bf16.vlgmr.msra.gmra.mrb[0].mxu1 %v2915_v59  ;;  %3316 = vmatmul.mubr.bf16.vlgmr.msra.gmra.mrb[0].mxu0 %v998_v58 }
 0x2e9   : > { %v1149_v61 = vpop.f32.mrb[0].mxu1  ;;  %v1104_v62 = vpop.f32.mrb[0].mxu0 }
 0x2ea   : > { %v1150_v63 = vadd.f32 %v2906_v60, %v1149_v61  ;;  %v3337_v0 = vpop.f32.mrb[1].mxu1  ;;  %v1105_v1 = vadd.f32 %v2906_v60, %v1104_v62  ;;  %v3317_v2 = vpop.f32.mrb[1].mxu0 }
 0x2eb   : > { %v1152_v3 = vpop.f32.mrb[2].mxu1  ;;  %v1107_v4 = vpop.f32.mrb[2].mxu0 }
 0x2ec   : > { %v1155_v5 = vmax.f32 %v1150_v63, 0.0  ;;  %v3338_v6 = vpop.f32.mrb[3].mxu1  ;;  %v1110_v7 = vmax.f32 %v1105_v1, 0.0  ;;  %v3318_v9 = vpop.f32.mrb[3].mxu0 }
 0x2ee   : > { %v3032_v10 = vpack.c.bf16 %v1155_v5, %v1155_v5  ;;  %v1156_v11 = vpack.c.bf16 %v1110_v7, %v1110_v7 }
 0x2f0   : > { %v1163_v12 = vshrl.u32 %v3032_v10, 16  ;;  %1157 = vst [vmem:[#allocation2] sm:$0xf] %v1156_v11  ;;  %v1166_v15 = vshll.u32 %v3032_v10, 16 }
 0x2f2   : > { %v1165_v13 = vrot.slane %v1163_v12, 7 }
 0x2f4   : > { %v1168_v18 = vor.u32 %v1166_v15, %v1165_v13  ;;  %v1169_v19 = vrot.slane %v1165_v13, 4 }
 0x2f6   : > { %v1173_v38 = vsel %vm4613_vm5, %v1168_v18, %v1172_v16  ;;  %v1176_v20 = vsel %vm4550_vm2, %v1169_v19, %v1175_v17 }
 0x2f7   : > { %1174 = vst [vmem:[#allocation3] sm:$0xf] %v1173_v38  ;;  %1177 = vst [vmem:[#allocation3 + $0x4] sm:$0x1] %v1176_v20 }
 0x2f8 PF: > { %v3747_v21 = vld [vmem:[#allocation12 + $0x40] sm:$0xff]   ;;  %v3749_v23 = vld [vmem:[#allocation12 + $0x48] sm:$0xff]   ;;  %v3751_v25 = vld [vmem:[#allocation12 + $0x50] sm:$0xff]   ;;  %vm1445_vm7 = vsmask.f32 3328  ;;  %s4851_s6 = sld [smem:[#allocation31_spill]] }
 0x2f9   : > { %v3748_v22 = vld [vmem:[#allocation12 + $0x100] sm:$0xff]   ;;  %3339 = vmatprep.subr.bf16.mxu1 %v3747_v21  ;;  %v3750_v24 = vld [vmem:[#allocation12 + $0x108] sm:$0xff]   ;;  %v3752_v26 = vld [vmem:[#allocation12 + $0x110] sm:$0xff]   ;;  %vm1446_vm8 = vsmask.f32 7440  ;;  %s4852_s12 = sld [smem:[#allocation22_spill]] }
 0x2fa   : > { %3419 = vmatprep.subr.bf16.mxu0 %v3748_v22  ;;  %3340 = vmatpush3.bf16.msra.mxu1 %v3747_v21  ;;  %v3753_v8 = vld [vmem:[#allocation12 + $0x58] sm:$0xff]   ;;  %v3755_v27 = vld [vmem:[#allocation12 + $0x60] sm:$0xff]   ;;  %v3757_v29 = vld [vmem:[#allocation12 + $0x68] sm:$0xff]   ;;  %s4853_s20 = sld [smem:[#allocation23_spill]]  ;;  %s4854_s16 = sld [smem:[#allocation33_spill]] }
 0x2fb   : > { %3420 = vmatpush3.bf16.msra.mxu0 %v3748_v22  ;;  %3341 = vmatprep.subr.bf16.mxu1 %v3749_v23  ;;  %v3754_v14 = vld [vmem:[#allocation12 + $0x118] sm:$0xff]   ;;  %v3756_v28 = vld [vmem:[#allocation12 + $0x120] sm:$0xff]   ;;  %v3758_v31 = vld [vmem:[#allocation12 + $0x128] sm:$0xff]   ;;  %s2707_s7 = sshll.u32 %s4659_s24, 4  ;;  %s4855_s27 = sld [smem:[#allocation34_spill]]  ;;  %s4715_s7 = int_to_ptr.vmem [resolvable:$true] %s2707_s7 }
 0x2fc   : > { %3421 = vmatprep.subr.bf16.mxu0 %v3750_v24  ;;  %v3763_v30 = vld [vmem:[#allocation2] sm:$0xff]   ;;  %v3764_v37 = vld [vmem:[#allocation12] sm:$0xff]   ;;  %v3769_v42 = vld [vmem:[#allocation12 + $0x8] sm:$0xff]   ;;  %s2692_s4 = scalar_lea.sflag [#allocation8], %s4498_s3  ;;  %p4857_p2 = scmp.ne.s32.totalorder %s4824_s5, 0 }
 0x2fd   : > { %3355 = vmatprep.mubr.bf16.mxu1 %v3763_v30  ;;  %v3765_v32 = vld [vmem:[#allocation4] sm:$0xff]   ;;  %v3761_v35 = vld [vmem:[#allocation12 + $0x78] sm:$0xff]   ;;  %v3766_v39 = vld [vmem:[#allocation12 + $0x140] sm:$0xff]  }
 0x2fe   : > { %3342 = vmatpush3.bf16.msra.mxu1 %v3749_v23  ;;  %v3759_v33 = vld [vmem:[#allocation12 + $0x70] sm:$0xff]   ;;  %3435 = vmatprep.mubr.bf16.mxu0 %v3765_v32  ;;  %v3762_v36 = vld [vmem:[#allocation12 + $0x138] sm:$0xff]   ;;  %v3770_v43 = vld [vmem:[#allocation12 + $0x148] sm:$0xff]  }
 0x2ff   : > { %3422 = vmatpush3.bf16.msra.mxu0 %v3750_v24  ;;  %3343 = vmatprep.subr.bf16.mxu1 %v3751_v25  ;;  %v3760_v34 = vld [vmem:[#allocation12 + $0x130] sm:$0xff]   ;;  %v3767_v40 = vld [vmem:[#allocation2 + $0x8] sm:$0xff]   ;;  %v1899_v48 = vld [vmem:[#allocation5 + $0x4] sm:$0x1]  ;;  %s3018_s22 = sshll.u32 %s4852_s12, 2  ;;  %s4131_s12 = smov [#allocation15]  }
 0x300   : > { %3423 = vmatprep.subr.bf16.mxu0 %v3752_v26  ;;  %v3768_v41 = vld [vmem:[#allocation4 + $0x8] sm:$0xff]   ;;  %v3771_v44 = vld [vmem:[#allocation12 + $0x10] sm:$0xff]   ;;  %v1898_v47 = vld [vmem:[#allocation5] sm:$0xf]  ;;  %v1916_v54 = vshll.u32 %v1899_v48, 16  ;;  %s3019_s17 = sshll.u32 %s4853_s20, 3 }
 0x301   : > { %v3783_v45 = vld [vmem:[#allocation3] ss:$8 sps:$4 sm:$0xff]   ;;  %v1907_v50 = vshrl.u32 %v1898_v47, 16  ;;  %v1910_v51 = vshll.u32 %v1898_v47, 16  ;;  %v3773_v52 = vld [vmem:[#allocation12 + $0x18] sm:$0xff]   ;;  %v3775_v61 = vld [vmem:[#allocation12 + $0x20] sm:$0xff]   ;;  %s2704_s21 = sadd.s32 %s3019_s17, %s3018_s22  ;;  %s4856_s19 = smov %s4855_s27 }
 0x302   : > { %3344 = vmatpush3.bf16.msra.mxu1 %v3751_v25  ;;  %v3772_v46 = vld [vmem:[#allocation12 + $0x150] sm:$0xff]   ;;  %v1900_v49 = vld [vmem:[#allocation5 + $0x8] sm:$0xf]  ;;  %v1901_v53 = vld [vmem:[#allocation5 + $0xc] sm:$0x1]  ;;  %v1918_v2 = vrot.slane %v1916_v54, 5 }
 0x303   : > { %3424 = vmatpush3.bf16.msra.mxu0 %v3752_v26  ;;  %3345 = vmatprep.subr.bf16.mxu1 %v3753_v8  ;;  %v1921_v55 = vshrl.u32 %v1900_v49, 16  ;;  %v1924_v56 = vshll.u32 %v1900_v49, 16  ;;  %v3774_v57 = vld [vmem:[#allocation12 + $0x158] sm:$0xff]   ;;  %v1909_v58 = vrot.slane %v1907_v50, 4  ;;  %v1912_v59 = vrot.slane %v1910_v51, 5  ;;  %v3776_v0 = vld [vmem:[#allocation12 + $0x160] sm:$0xff]   ;;  %vm4673_vm9 = vmor %vm1445_vm7, %vm1446_vm8 }
 0x304   : > { %3425 = vmatprep.subr.bf16.mxu0 %v3754_v14  ;;  %v1930_v60 = vshll.u32 %v1901_v53, 16  ;;  %v1902_v6 = vld [vmem:[#allocation5 + $0x10] sm:$0xf]  ;;  %v1903_v7 = vld [vmem:[#allocation5 + $0x14] sm:$0x1]  ;;  %v3777_v17 = vld [vmem:[#allocation12 + $0x28] sm:$0xff]  }
 0x305   : > { %v1923_v62 = vrot.slane %v1921_v55, 4  ;;  %v1926_v63 = vrot.slane %v1924_v56, 5  ;;  %v1913_v1 = vor.u32 %v1912_v59, %v1909_v58  ;;  %v1904_v10 = vld [vmem:[#allocation5 + $0x18] sm:$0xf]  ;;  %v1905_v11 = vld [vmem:[#allocation5 + $0x1c] sm:$0x1] }
 0x306   : > { %3346 = vmatpush3.bf16.msra.mxu1 %v3753_v8  ;;  %v1932_v5 = vrot.slane %v1930_v60, 5  ;;  %v1935_v12 = vshrl.u32 %v1902_v6, 16  ;;  %v1938_v15 = vshll.u32 %v1902_v6, 16  ;;  %v1949_v16 = vshrl.u32 %v1904_v10, 16  ;;  %v3778_v20 = vld [vmem:[#allocation12 + $0x168] sm:$0xff]   ;;  %v3781_v30 = vld [vmem:[#allocation12 + $0x38] sm:$0xff]  }
 0x307   : > { %3426 = vmatpush3.bf16.msra.mxu0 %v3754_v14  ;;  %3347 = vmatprep.subr.bf16.mxu1 %v3755_v27  ;;  %v1927_v4 = vor.u32 %v1926_v63, %v1923_v62  ;;  %v1914_v9 = vrot.slane %v1913_v1, 4  ;;  %v1944_v19 = vshll.u32 %v1903_v7, 16  ;;  %v1952_v38 = vshll.u32 %v1904_v10, 16  ;;  %v3779_v14 = vld [vmem:[#allocation12 + $0x30] sm:$0xff]   ;;  %v3787_v53 = vld [vmem:[#allocation12 + $0x88] sm:$0xff]   ;;  %s3020_s26 = sshll.u32 %s2704_s21, 6 }
 0x308   : > { %3427 = vmatprep.subr.bf16.mxu0 %v3756_v28  ;;  %v1937_v22 = vrot.slane %v1935_v12, 4  ;;  %v1940_v23 = vrot.slane %v1938_v15, 5  ;;  %v1951_v24 = vrot.slane %v1949_v16, 4  ;;  %v1958_v8 = vshll.u32 %v1905_v11, 16  ;;  %v3802_v59 = vld [vmem:[#allocation3 + $0x8] ss:$8 sps:$4 sm:$0xff]   ;;  %s4713_s23 = scalar_lea.hbm %s4855_s27, %s3020_s26 }
 0x309   : > { %v1928_v13 = vrot.slane %v1927_v4, 4  ;;  %v1919_v18 = vsel %vm4673_vm9, %v1914_v9, %v1918_v2  ;;  %v1954_v26 = vrot.slane %v1952_v38, 5  ;;  %v3790_v2 = vld [vmem:[#allocation12 + $0x190] sm:$0xff]   ;;  %v1441_v9 = vld [vmem:[#allocation3 + $0x10] sm:$0xf]  ;;  %v3836_v3 = vld [vmem:[#allocation14 + $0x28] sm:$0xff]  }
 0x30a   : > { %3348 = vmatpush3.bf16.msra.mxu1 %v3755_v27  ;;  %v1941_v27 = vor.u32 %v1940_v23, %v1937_v22  ;;  %v1960_v32 = vrot.slane %v1958_v8, 5  ;;  %v1443_v10 = vld [vmem:[#allocation3 + $0x18] sm:$0xf]  ;;  %v3792_v12 = vld [vmem:[#allocation12 + $0x198] sm:$0xff]   ;;  %v1477_v15 = vshrl.u32 %v1441_v9, 16  ;;  %v1480_v16 = vshll.u32 %v1441_v9, 16 }
 0x30b   : > { %3428 = vmatpush3.bf16.msra.mxu0 %v3756_v28  ;;  %3349 = vmatprep.subr.bf16.mxu1 %v3757_v29  ;;  %v1933_v21 = vsel %vm4673_vm9, %v1928_v13, %v1932_v5  ;;  %v1955_v28 = vor.u32 %v1954_v26, %v1951_v24  ;;  %v3791_v5 = vld [vmem:[#allocation12 + $0x98] sm:$0xff]   ;;  %v3793_v13 = vld [vmem:[#allocation12 + $0xa0] sm:$0xff]   ;;  %v3796_v26 = vld [vmem:[#allocation12 + $0x1a8] sm:$0xff]   ;;  %s3987_s20 = sshll.u32 %s4131_s12, 4  ;;  %s3988_s20 = int_to_ptr.vmem [resolvable:$false] %s3987_s20 }
 0x30c   : > { %3429 = vmatprep.subr.bf16.mxu0 %v3758_v31  ;;  %v2967_v25 = vcombine.low %v1919_v18, %v1933_v21  ;;  %v1494_v18 = vshll.u32 %v1443_v10, 16  ;;  %v1442_v38 = vld [vmem:[#allocation3 + $0x14] sm:$0x1]  ;;  %v1479_v21 = vrot.slane %v1477_v15, 4  ;;  %v1482_v22 = vrot.slane %v1480_v16, 5  ;;  %s3989_s22 = scalar_lea.vmem %s3988_s20, 512  ;;  %p3990_p4 = scmp.lt.s32.totalorder %s4715_s7, %s3988_s20 }
 0x30d   : > { %v1486_v8 = vshll.u32 %v1442_v38, 16 }
 0x30e   : > { %3350 = vmatpush3.bf16.msra.mxu1 %v3757_v29  ;;  %v3780_v29 = vld [vmem:[#allocation12 + $0x170] sm:$0xff]   ;;  %v1496_v24 = vrot.slane %v1494_v18, 5 }
 0x30f   : > { %3430 = vmatpush3.bf16.msra.mxu0 %v3758_v31  ;;  %3351 = vmatprep.subr.bf16.mxu1 %v3759_v33  ;;  %v1946_v31 = vrot.slane %v1944_v19, 5  ;;  %v3794_v19 = vld [vmem:[#allocation12 + $0x1a0] sm:$0xff]  }
 0x310   : > { %3431 = vmatprep.subr.bf16.mxu0 %v3760_v34 }
 0x312   : > { %3352 = vmatpush3.bf16.msra.mxu1 %v3759_v33  ;;  %v1942_v33 = vrot.slane %v1941_v27, 4  ;;  %v1483_v27 = vor.u32 %v1482_v22, %v1479_v21  ;;  %v3820_v21 = vld [vmem:[#allocation5 + $0x10] ss:$8 sps:$4 sm:$0xff]   ;;  %v3823_v22 = vld [vmem:[#allocation2 + $0xc] sm:$0xff]  }
 0x313   : > { %3432 = vmatpush3.bf16.msra.mxu0 %v3760_v34  ;;  %3353 = vmatprep.subr.bf16.mxu1 %v3761_v35  ;;  %v1956_v34 = vrot.slane %v1955_v28, 4 }
 0x314   : > { %3433 = vmatprep.subr.bf16.mxu0 %v3762_v36 }
 0x316   : > { %3354 = vmatpush3.bf16.msra.mxu1 %v3761_v35  ;;  %v3782_v35 = vld [vmem:[#allocation12 + $0x178] sm:$0xff]  }
 0x317   : > { %3434 = vmatpush3.bf16.msra.mxu0 %v3762_v36  ;;  %3359 = vmatprep.subr.bf16.mxu1 %v3764_v37  ;;  %v3784_v36 = vld [vmem:[#allocation12 + $0x80] sm:$0xff]  }
 0x318   : > { %3439 = vmatprep.subr.bf16.mxu0 %v3766_v39 }
 0x319   : > { %3356 = vmatmul.mubr.bf16.vlgmr.msra.gmra.mrb[0].mxu1 %v3767_v40  ;;  %v1947_v40 = vsel %vm4673_vm9, %v1942_v33, %v1946_v31  ;;  %v1488_v31 = vrot.slane %v1486_v8, 5  ;;  %v1484_v33 = vrot.slane %v1483_v27, 4  ;;  %v2360_v8 = vld [vmem:[#allocation3 + $0x18] sm:$0xf] }
 0x31a   : > { %3360 = vmatpush3.bf16.msra.mxu1 %v3764_v37  ;;  %3436 = vmatmul.mubr.bf16.vlgmr.msra.gmra.mrb[0].mxu0 %v3768_v41  ;;  %v3785_v37 = vld [vmem:[#allocation12 + $0x180] sm:$0xff]   ;;  %v1961_v41 = vsel %vm4673_vm9, %v1956_v34, %v1960_v32  ;;  %v2393_v27 = vshrl.u32 %v2360_v8, 16 }
 0x31b   : > { %3440 = vmatpush3.bf16.msra.mxu0 %v3766_v39  ;;  %3361 = vmatprep.subr.bf16.mxu1 %v3769_v42  ;;  %v3786_v39 = vld [vmem:[#allocation3 + $0x10] ss:$8 sps:$4 sm:$0xff]   ;;  %v2968_v50 = vcombine.low %v1947_v40, %v1961_v41 }
 0x31c   : > { %3441 = vmatprep.subr.bf16.mxu0 %v3770_v43  ;;  %3375 = vmatprep.mubr.bf16.mxu1 %v3783_v45  ;;  %v1440_v45 = vld [vmem:[#allocation3 + $0xc] sm:$0x1]  ;;  %v3801_v40 = vld [vmem:[#allocation12 + $0xc0] sm:$0xff]  }
 0x31d   : > { %3455 = vmatprep.mubr.bf16.mxu0 %v2967_v25  ;;  %v3795_v25 = vld [vmem:[#allocation12 + $0xa8] sm:$0xff]   ;;  %v3803_v41 = vld [vmem:[#allocation12 + $0x1c0] sm:$0xff]  }
 0x31e   : > { %3362 = vmatpush3.bf16.msra.mxu1 %v3769_v42  ;;  %v1437_v42 = vld [vmem:[#allocation3] sm:$0xf] }
 0x31f   : > { %3442 = vmatpush3.bf16.msra.mxu0 %v3770_v43  ;;  %3363 = vmatprep.subr.bf16.mxu1 %v3771_v44  ;;  %v1438_v43 = vld [vmem:[#allocation3 + $0x4] sm:$0x1]  ;;  %v1452_v47 = vshll.u32 %v1437_v42, 16 }
 0x320   : > { %3443 = vmatprep.subr.bf16.mxu0 %v3772_v46  ;;  %v1458_v48 = vshll.u32 %v1438_v43, 16  ;;  %v3804_v43 = vld [vmem:[#allocation3 + $0x18] ss:$8 sps:$4 sm:$0xff]  }
 0x321   : > { %v1454_v55 = vrot.slane %v1452_v47, 5  ;;  %v3821_v47 = vld [vmem:[#allocation2 + $0x4] sm:$0xff]  }
 0x322   : > { %3364 = vmatpush3.bf16.msra.mxu1 %v3771_v44  ;;  %v1439_v44 = vld [vmem:[#allocation3 + $0x8] sm:$0xf] }
 0x323   : > { %3444 = vmatpush3.bf16.msra.mxu0 %v3772_v46  ;;  %3365 = vmatprep.subr.bf16.mxu1 %v3773_v52  ;;  %v1449_v46 = vshrl.u32 %v1437_v42, 16  ;;  %v1463_v49 = vshrl.u32 %v1439_v44, 16  ;;  %v1466_v51 = vshll.u32 %v1439_v44, 16  ;;  %v3805_v44 = vld [vmem:[#allocation12 + $0xc8] sm:$0xff]  }
 0x324   : > { %3445 = vmatprep.subr.bf16.mxu0 %v3774_v57 }
 0x325   : > { %v1451_v54 = vrot.slane %v1449_v46, 4  ;;  %v1465_v56 = vrot.slane %v1463_v49, 4  ;;  %v1468_v58 = vrot.slane %v1466_v51, 5  ;;  %v3819_v46 = vld [vmem:[#allocation5] ss:$8 sps:$4 sm:$0xff]   ;;  %v3808_v49 = vld [vmem:[#allocation12 + $0x1d0] sm:$0xff]  }
 0x326   : > { %3366 = vmatpush3.bf16.msra.mxu1 %v3773_v52  ;;  %v1472_v52 = vshll.u32 %v1440_v45, 16  ;;  %v3806_v45 = vld [vmem:[#allocation12 + $0x1c8] sm:$0xff]   ;;  %v3810_v51 = vld [vmem:[#allocation12 + $0x1d8] sm:$0xff]  }
 0x327   : > { %3446 = vmatpush3.bf16.msra.mxu0 %v3774_v57  ;;  %3367 = vmatprep.subr.bf16.mxu1 %v3775_v61  ;;  %v3788_v57 = vld [vmem:[#allocation12 + $0x188] sm:$0xff]   ;;  %v1455_v60 = vor.u32 %v1454_v55, %v1451_v54  ;;  %v1469_v62 = vor.u32 %v1468_v58, %v1465_v56  ;;  %v3811_v54 = vld [vmem:[#allocation12 + $0xe0] sm:$0xff]  }
 0x328   : > { %3447 = vmatprep.subr.bf16.mxu0 %v3776_v0  ;;  %v1474_v63 = vrot.slane %v1472_v52, 5  ;;  %v2356_v52 = vld [vmem:[#allocation3 + $0x8] sm:$0xf]  ;;  %v3812_v55 = vld [vmem:[#allocation12 + $0x1e0] sm:$0xff]  }
 0x329   : > { %v1456_v1 = vrot.slane %v1455_v60, 4  ;;  %v1470_v4 = vrot.slane %v1469_v62, 4  ;;  %v2365_v56 = vshrl.u32 %v2356_v52, 16  ;;  %v3813_v60 = vld [vmem:[#allocation12 + $0xe8] sm:$0xff]  }
 0x32a   : > { %3368 = vmatpush3.bf16.msra.mxu1 %v3775_v61  ;;  %v1460_v61 = vrot.slane %v1458_v48, 5  ;;  %v3807_v48 = vld [vmem:[#allocation12 + $0xd0] sm:$0xff]  }
 0x32b   : > { %3448 = vmatpush3.bf16.msra.mxu0 %v3776_v0  ;;  %3369 = vmatprep.subr.bf16.mxu1 %v3777_v17  ;;  %v3789_v0 = vld [vmem:[#allocation12 + $0x90] sm:$0xff]   ;;  %v1475_v7 = vsel %vm4673_vm9, %v1470_v4, %v1474_v63  ;;  %v2367_v62 = vrot.slane %v2365_v56, 4  ;;  %v2359_v4 = vld [vmem:[#allocation3 + $0x14] sm:$0x1] }
 0x32c   : > { %3449 = vmatprep.subr.bf16.mxu0 %v3778_v20  ;;  %v1461_v6 = vsel %vm4673_vm9, %v1456_v1, %v1460_v61  ;;  %v3814_v61 = vld [vmem:[#allocation12 + $0x1e8] sm:$0xff]   ;;  %v3834_v56 = vld [vmem:[#allocation14 + $0x18] sm:$0xff]  }
 0x32d   : > { %v2937_v11 = vcombine.low %v1461_v6, %v1475_v7  ;;  %v3816_v6 = vld [vmem:[#allocation12 + $0x1f0] sm:$0xff]  }
 0x32e   : > { %3370 = vmatpush3.bf16.msra.mxu1 %v3777_v17  ;;  %v1491_v17 = vshrl.u32 %v1443_v10, 16 }
 0x32f   : > { %3450 = vmatpush3.bf16.msra.mxu0 %v3778_v20  ;;  %3371 = vmatprep.subr.bf16.mxu1 %v3779_v14  ;;  %v1444_v20 = vld [vmem:[#allocation3 + $0x1c] sm:$0x1] }
 0x330   : > { %3451 = vmatprep.subr.bf16.mxu0 %v3780_v29  ;;  %v1493_v23 = vrot.slane %v1491_v17, 4 }
 0x332   : > { %3372 = vmatpush3.bf16.msra.mxu1 %v3779_v14  ;;  %v1500_v14 = vshll.u32 %v1444_v20, 16  ;;  %v1497_v28 = vor.u32 %v1496_v24, %v1493_v23  ;;  %v3824_v24 = vld [vmem:[#allocation12 + $0x208] sm:$0xff]  }
 0x333   : > { %3452 = vmatpush3.bf16.msra.mxu0 %v3780_v29  ;;  %3373 = vmatprep.subr.bf16.mxu1 %v3781_v30  ;;  %v3797_v29 = vld [vmem:[#allocation12 + $0xb0] sm:$0xff]  }
 0x334   : > { %3453 = vmatprep.subr.bf16.mxu0 %v3782_v35  ;;  %v1502_v32 = vrot.slane %v1500_v14, 5  ;;  %v1498_v34 = vrot.slane %v1497_v28, 4  ;;  %v2362_v14 = vld [vmem:[#allocation3 + $0x20] sm:$0xf]  ;;  %v2396_v28 = vshll.u32 %v2360_v8, 16 }
 0x336   : > { %3374 = vmatpush3.bf16.msra.mxu1 %v3781_v30  ;;  %v3798_v30 = vld [vmem:[#allocation12 + $0x1b0] sm:$0xff]  }
 0x337   : > { %3454 = vmatpush3.bf16.msra.mxu0 %v3782_v35  ;;  %3379 = vmatprep.subr.bf16.mxu1 %v3784_v36  ;;  %v3799_v35 = vld [vmem:[#allocation12 + $0xb8] sm:$0xff]  }
 0x338   : > { %3459 = vmatprep.subr.bf16.mxu0 %v3785_v37 }
 0x339   : > { %3376 = vmatmul.mubr.bf16.vlgmr.msra.gmra.mrb[0].mxu1 %v3786_v39  ;;  %v1503_v39 = vsel %vm4673_vm9, %v1498_v34, %v1502_v32  ;;  %v2395_v32 = vrot.slane %v2393_v27, 4 }
 0x33a   : > { %3380 = vmatpush3.bf16.msra.mxu1 %v3784_v36  ;;  %3456 = vmatmul.mubr.bf16.vlgmr.msra.gmra.mrb[0].mxu0 %v2968_v50  ;;  %v3800_v36 = vld [vmem:[#allocation12 + $0x1b8] sm:$0xff]  }
 0x33b   : > { %3460 = vmatpush3.bf16.msra.mxu0 %v3785_v37  ;;  %3381 = vmatprep.subr.bf16.mxu1 %v3787_v53  ;;  %v1489_v37 = vsel %vm4673_vm9, %v1484_v33, %v1488_v31  ;;  %v3809_v50 = vld [vmem:[#allocation12 + $0xd8] sm:$0xff]   ;;  %v3827_v31 = vld [vmem:[#allocation12 + $0x220] sm:$0xff]   ;;  %v2398_v33 = vrot.slane %v2396_v28, 5 }
 0x33c   : > { %3461 = vmatprep.subr.bf16.mxu0 %v3788_v57  ;;  %3475 = vmatprep.mubr.bf16.mxu0 %v3802_v59  ;;  %v2938_v42 = vcombine.low %v1489_v37, %v1503_v39  ;;  %v2361_v37 = vld [vmem:[#allocation3 + $0x1c] sm:$0x1]  ;;  %v2363_v39 = vld [vmem:[#allocation3 + $0x24] sm:$0x1] }
 0x33d   : > { %3395 = vmatprep.mubr.bf16.mxu1 %v2937_v11  ;;  %v2388_v11 = vshll.u32 %v2359_v4, 16 }
 0x33e   : > { %3382 = vmatpush3.bf16.msra.mxu1 %v3787_v53  ;;  %v2358_v53 = vld [vmem:[#allocation3 + $0x10] sm:$0xf] }
 0x33f   : > { %3462 = vmatpush3.bf16.msra.mxu0 %v3788_v57  ;;  %3383 = vmatprep.subr.bf16.mxu1 %v3789_v0  ;;  %v2368_v57 = vshll.u32 %v2356_v52, 16  ;;  %v2379_v58 = vshrl.u32 %v2358_v53, 16  ;;  %v2382_v59 = vshll.u32 %v2358_v53, 16  ;;  %v2390_v18 = vrot.slane %v2388_v11, 5  ;;  %v3831_v53 = vld [vmem:[#allocation14] sm:$0xff]  }
 0x340   : > { %3463 = vmatprep.subr.bf16.mxu0 %v3790_v2 }
 0x341   : > { %v2370_v63 = vrot.slane %v2368_v57, 5  ;;  %v2384_v1 = vrot.slane %v2382_v59, 5  ;;  %v3835_v57 = vld [vmem:[#allocation14 + $0x20] sm:$0xff]   ;;  %v3838_v59 = vld [vmem:[#allocation14 + $0x38] sm:$0xff]  }
 0x342   : > { %3384 = vmatpush3.bf16.msra.mxu1 %v3789_v0  ;;  %v2381_v0 = vrot.slane %v2379_v58, 4  ;;  %v3837_v58 = vld [vmem:[#allocation14 + $0x30] sm:$0xff]  }
 0x343   : > { %3464 = vmatpush3.bf16.msra.mxu0 %v3790_v2  ;;  %3385 = vmatprep.subr.bf16.mxu1 %v3791_v5  ;;  %v2357_v2 = vld [vmem:[#allocation3 + $0xc] sm:$0x1]  ;;  %v2371_v7 = vor.u32 %v2370_v63, %v2367_v62 }
 0x344   : > { %3465 = vmatprep.subr.bf16.mxu0 %v3792_v12  ;;  %v2374_v9 = vshll.u32 %v2357_v2, 16  ;;  %v2385_v10 = vor.u32 %v2384_v1, %v2381_v0  ;;  %v3007_v1 = vld [vmem:[%s4851_s6] ss:$0 sm:$0xff]  ;;  %s3983_s6 = scalar_lea.vmem %s4715_s7, 256 }
 0x345   : > { %v2372_v15 = vrot.slane %v2371_v7, 4  ;;  %p3984_p1 = scmp.ne.s32.totalorder %s4715_s7, %s3983_s6  ;;  %p3991_p6 = scmp.lt.s32.totalorder %s3989_s22, %s3983_s6 }
 0x346   : > { %3386 = vmatpush3.bf16.msra.mxu1 %v3791_v5  ;;  %v3815_v5 = vld [vmem:[#allocation12 + $0xf0] sm:$0xff]   ;;  %v2376_v16 = vrot.slane %v2374_v9, 5  ;;  %v2386_v17 = vrot.slane %v2385_v10, 4 }
 0x347   : > { %3466 = vmatpush3.bf16.msra.mxu0 %v3792_v12  ;;  %3387 = vmatprep.subr.bf16.mxu1 %v3793_v13  ;;  %v3817_v12 = vld [vmem:[#allocation12 + $0xf8] sm:$0xff]   ;;  %p3985_p12 = pnand %p3984_p1, %p4857_p2  ;;  %p3992_p3 = por %p3991_p6, %p3990_p4 }
 0x348   : > { %3467 = vmatprep.subr.bf16.mxu0 %v3794_v19  ;;  %v2377_v38 = vsel %vm4673_vm9, %v2372_v15, %v2376_v16  ;;  %v2391_v20 = vsel %vm4673_vm9, %v2386_v17, %v2390_v18 }
 0x349   : > { %v2997_v23 = vcombine.low %v2377_v38, %v2391_v20  ;;  %p3986_p7 = pneg %p3985_p12 }
 0x34a   : > { %3388 = vmatpush3.bf16.msra.mxu1 %v3793_v13  ;;  %v3818_v13 = vld [vmem:[#allocation12 + $0x1f8] sm:$0xff]  }
 0x34b   : > { %3468 = vmatpush3.bf16.msra.mxu0 %v3794_v19  ;;  %3389 = vmatprep.subr.bf16.mxu1 %v3795_v25  ;;  %v3822_v19 = vld [vmem:[#allocation12 + $0x200] sm:$0xff]   ;;  %p3993_p11 = pnand %p3992_p3, %p3986_p7 }
 0x34c   : > { %3469 = vmatprep.subr.bf16.mxu0 %v3796_v26 }
 0x34e   : > { %3390 = vmatpush3.bf16.msra.mxu1 %v3795_v25  ;;  %v3825_v25 = vld [vmem:[#allocation12 + $0x210] sm:$0xff]  }
 0x34f   : > { %3470 = vmatpush3.bf16.msra.mxu0 %v3796_v26  ;;  %3391 = vmatprep.subr.bf16.mxu1 %v3797_v29  ;;  %v3826_v26 = vld [vmem:[#allocation12 + $0x218] sm:$0xff]  }
 0x350   : > { %3471 = vmatprep.subr.bf16.mxu0 %v3798_v30 }
 0x352   : > { %3392 = vmatpush3.bf16.msra.mxu1 %v3797_v29  ;;  %v2407_v29 = vshrl.u32 %v2362_v14, 16 }
 0x353   : > { %3472 = vmatpush3.bf16.msra.mxu0 %v3798_v30  ;;  %3393 = vmatprep.subr.bf16.mxu1 %v3799_v35  ;;  %v2410_v30 = vshll.u32 %v2362_v14, 16 }
 0x354   : > { %3473 = vmatprep.subr.bf16.mxu0 %v3800_v36  ;;  %v2409_v34 = vrot.slane %v2407_v29, 4 }
 0x356   : > { %3394 = vmatpush3.bf16.msra.mxu1 %v3799_v35  ;;  %v2412_v35 = vrot.slane %v2410_v30, 5 }
 0x357   : > { %3474 = vmatpush3.bf16.msra.mxu0 %v3800_v36  ;;  %3399 = vmatprep.subr.bf16.mxu1 %v3801_v40  ;;  %v3828_v36 = vld [vmem:[#allocation12 + $0x228] sm:$0xff]  }
 0x358   : > { %3479 = vmatprep.subr.bf16.mxu0 %v3803_v41 }
 0x359   : > { %3396 = vmatmul.mubr.bf16.vlgmr.msra.gmra.mrb[0].mxu1 %v2938_v42  ;;  %v2413_v42 = vor.u32 %v2412_v35, %v2409_v34 }
 0x35a   : > { %3400 = vmatpush3.bf16.msra.mxu1 %v3801_v40  ;;  %3476 = vmatmul.mubr.bf16.vlgmr.msra.gmra.mrb[0].mxu0 %v3804_v43  ;;  %v2399_v40 = vor.u32 %v2398_v33, %v2395_v32  ;;  %v2416_v43 = vshll.u32 %v2363_v39, 16 }
 0x35b   : > { %3480 = vmatpush3.bf16.msra.mxu0 %v3803_v41  ;;  %3401 = vmatprep.subr.bf16.mxu1 %v3805_v44  ;;  %v2402_v41 = vshll.u32 %v2361_v37, 16 }
 0x35c   : > { %3481 = vmatprep.subr.bf16.mxu0 %v3806_v45  ;;  %3415 = vmatprep.mubr.bf16.mxu1 %v3819_v46 }
 0x35d   : > { %3495 = vmatprep.mubr.bf16.mxu0 %v3821_v47  ;;  %v2404_v46 = vrot.slane %v2402_v41, 5  ;;  %v2414_v47 = vrot.slane %v2413_v42, 4 }
 0x35e   : > { %3402 = vmatpush3.bf16.msra.mxu1 %v3805_v44  ;;  %v3829_v44 = vld [vmem:[#allocation12 + $0x230] sm:$0xff]  }
 0x35f   : > { %3482 = vmatpush3.bf16.msra.mxu0 %v3806_v45  ;;  %3403 = vmatprep.subr.bf16.mxu1 %v3807_v48  ;;  %v2400_v45 = vrot.slane %v2399_v40, 4 }
 0x360   : > { %3483 = vmatprep.subr.bf16.mxu0 %v3808_v49 }
 0x362   : > { %3404 = vmatpush3.bf16.msra.mxu1 %v3807_v48  ;;  %v2418_v48 = vrot.slane %v2416_v43, 5 }
 0x363   : > { %3484 = vmatpush3.bf16.msra.mxu0 %v3808_v49  ;;  %3405 = vmatprep.subr.bf16.mxu1 %v3809_v50  ;;  %v3830_v49 = vld [vmem:[#allocation12 + $0x238] sm:$0xff]  }
 0x364   : > { %3485 = vmatprep.subr.bf16.mxu0 %v3810_v51 }
 0x366   : > { %3406 = vmatpush3.bf16.msra.mxu1 %v3809_v50  ;;  %v2405_v50 = vsel %vm4673_vm9, %v2400_v45, %v2404_v46 }
 0x367   : > { %3486 = vmatpush3.bf16.msra.mxu0 %v3810_v51  ;;  %3407 = vmatprep.subr.bf16.mxu1 %v3811_v54  ;;  %v2419_v51 = vsel %vm4673_vm9, %v2414_v47, %v2418_v48 }
 0x368   : > { %3487 = vmatprep.subr.bf16.mxu0 %v3812_v55  ;;  %v2998_v52 = vcombine.low %v2405_v50, %v2419_v51 }
 0x36a   : > { %3408 = vmatpush3.bf16.msra.mxu1 %v3811_v54  ;;  %v3832_v54 = vld [vmem:[#allocation14 + $0x8] sm:$0xff]  }
 0x36b   : > { %3488 = vmatpush3.bf16.msra.mxu0 %v3812_v55  ;;  %3409 = vmatprep.subr.bf16.mxu1 %v3813_v60  ;;  %v3833_v55 = vld [vmem:[#allocation14 + $0x10] sm:$0xff]  }
 0x36c   : > { %3489 = vmatprep.subr.bf16.mxu0 %v3814_v61 }
 0x36e   : > { %3410 = vmatpush3.bf16.msra.mxu1 %v3813_v60 }
 0x36f   : > { %3490 = vmatpush3.bf16.msra.mxu0 %v3814_v61  ;;  %3411 = vmatprep.subr.bf16.mxu1 %v3815_v5 }
 0x370   : > { %3491 = vmatprep.subr.bf16.mxu0 %v3816_v6 }
 0x372   : > { %3412 = vmatpush3.bf16.msra.mxu1 %v3815_v5 }
 0x373   : > { %3492 = vmatpush3.bf16.msra.mxu0 %v3816_v6  ;;  %3413 = vmatprep.subr.bf16.mxu1 %v3817_v12 }
 0x374   : > { %3493 = vmatprep.subr.bf16.mxu0 %v3818_v13 }
 0x376   : > { %3414 = vmatpush3.bf16.msra.mxu1 %v3817_v12 }
 0x377   : > { %3494 = vmatpush3.bf16.msra.mxu0 %v3818_v13  ;;  %3519 = vmatprep.subr.bf16.mxu1 %v3831_v53 }
 0x378   : > { %3499 = vmatprep.subr.bf16.mxu0 %v3822_v19 }
 0x379   : > { %3416 = vmatmul.mubr.bf16.vlgmr.msra.gmra.mrb[0].mxu1 %v3820_v21 }
 0x37a   : > { %3496 = vmatmul.mubr.bf16.vlgmr.msra.gmra.mrb[0].mxu0 %v3823_v22  ;;  %3520 = vmatpush3.bf16.msra.mxu1 %v3831_v53  ;;  %v3008_v22 = vld [vmem:[%s4854_s16] ss:$0 sm:$0xff] }
 0x37b   : > { %3500 = vmatpush3.bf16.msra.mxu0 %v3822_v19  ;;  %3515 = vmatprep.mubr.bf16.mxu0 %v2997_v23 }
 0x37c   : > { %3501 = vmatprep.subr.bf16.mxu0 %v3824_v24  ;;  %3521 = vmatprep.subr.bf16.mxu1 %v3832_v54 }
 0x37e   : > { %3522 = vmatpush3.bf16.msra.mxu1 %v3832_v54 }
 0x37f   : > { %3502 = vmatpush3.bf16.msra.mxu0 %v3824_v24  ;;  %3523 = vmatprep.subr.bf16.mxu1 %v3833_v55 }
 0x380   : > { %3503 = vmatprep.subr.bf16.mxu0 %v3825_v25 }
 0x382   : > { %3524 = vmatpush3.bf16.msra.mxu1 %v3833_v55 }
 0x383   : > { %3504 = vmatpush3.bf16.msra.mxu0 %v3825_v25  ;;  %3525 = vmatprep.subr.bf16.mxu1 %v3834_v56 }
 0x384   : > { %3505 = vmatprep.subr.bf16.mxu0 %v3826_v26 }
 0x386   : > { %3526 = vmatpush3.bf16.msra.mxu1 %v3834_v56 }
 0x387   : > { %3506 = vmatpush3.bf16.msra.mxu0 %v3826_v26  ;;  %3527 = vmatprep.subr.bf16.mxu1 %v3835_v57 }
 0x388   : > { %3507 = vmatprep.subr.bf16.mxu0 %v3827_v31 }
 0x38a   : > { %3528 = vmatpush3.bf16.msra.mxu1 %v3835_v57 }
 0x38b   : > { %3508 = vmatpush3.bf16.msra.mxu0 %v3827_v31  ;;  %3529 = vmatprep.subr.bf16.mxu1 %v3836_v3 }
 0x38c   : > { %3509 = vmatprep.subr.bf16.mxu0 %v3828_v36 }
 0x38e   : > { %3530 = vmatpush3.bf16.msra.mxu1 %v3836_v3 }
 0x38f   : > { %3510 = vmatpush3.bf16.msra.mxu0 %v3828_v36  ;;  %3531 = vmatprep.subr.bf16.mxu1 %v3837_v58 }
 0x390   : > { %3511 = vmatprep.subr.bf16.mxu0 %v3829_v44 }
 0x392   : > { %3532 = vmatpush3.bf16.msra.mxu1 %v3837_v58 }
 0x393   : > { %3512 = vmatpush3.bf16.msra.mxu0 %v3829_v44  ;;  %3533 = vmatprep.subr.bf16.mxu1 %v3838_v59 }
 0x394   : > { %3513 = vmatprep.subr.bf16.mxu0 %v3830_v49 }
 0x396   : > { %3534 = vmatpush3.bf16.msra.mxu1 %v3838_v59 }
 0x397   : > { %3514 = vmatpush3.bf16.msra.mxu0 %v3830_v49 }
 0x39a   : > { %3516 = vmatmul.mubr.bf16.vlgmr.msra.gmra.mrb[0].mxu0 %v2998_v52 }
 0x44c   : > { %v3417_v60 = vpop.f32.mrb[0].mxu1 }
 0x44d   : > { %v1745_v61 = vpop.f32.mrb[1].mxu1 }
 0x44e   : > { %v3418_v62 = vpop.f32.mrb[2].mxu1 }
 0x44f   : > { %v1748_v63 = vpop.f32.mrb[3].mxu1 }
 0x46d   : > { %v3517_v0 = vpop.f32.mrb[0].mxu0 }
 0x46e   : > { %v3539_v2 = vadd.f32 %v3517_v0, %v3417_v60  ;;  %v2527_v4 = vpop.f32.mrb[1].mxu0 }
 0x46f   : > { %v3540_v5 = vadd.f32 %v2527_v4, %v1745_v61  ;;  %v3518_v6 = vpop.f32.mrb[2].mxu0 }
 0x470   : > { %v2555_v7 = vadd.f32 %v3539_v2, %v3007_v1  ;;  %v3541_v9 = vadd.f32 %v3518_v6, %v3418_v62  ;;  %v2530_v10 = vpop.f32.mrb[3].mxu0 }
 0x471   : > { %v2553_v11 = vadd.f32 %v3540_v5, %v3007_v1  ;;  %v3542_v12 = vadd.f32 %v2530_v10, %v1748_v63 }
 0x472   : > { %v2556_v13 = vadd.f32 %v3541_v9, %v3007_v1  ;;  %v2559_v16 = vmax.f32 %v2555_v7, 0.0 }
 0x473   : > { %v2554_v15 = vadd.f32 %v3542_v12, %v3007_v1  ;;  %v2557_v18 = vmax.f32 %v2553_v11, 0.0 }
 0x474   : > { %v2560_v17 = vmax.f32 %v2556_v13, 0.0 }
 0x475   : > { %v2558_v19 = vmax.f32 %v2554_v15, 0.0 }
 0x476   : > { %v2562_v38 = vpack.c.bf16 %v2560_v17, %v2559_v16 }
 0x477   : > { %v2561_v20 = vpack.c.bf16 %v2558_v19, %v2557_v18 }
 0x479   : > { %3535 = vmatprep.mubr.bf16.mxu1 %v2561_v20 }
 0x47a   : > { %3536 = vmatmul.mubr.bf16.vlgmr.msra.gmra.mrb[4].mxu1 %v2562_v38 }
 0x54d   : > { %v3537_v21 = vpop.f32.mrb[4].mxu1 }
 0x54e   : > { %v2668_v23 = vpop.f32.mrb[5].mxu1  ;;  %v2677_v25 = vadd.f32 %v3537_v21, %v3008_v22 }
 0x54f   : > { %v3538_v24 = vpop.f32.mrb[6].mxu1  ;;  %v2669_v14 = vadd.f32 %v3008_v22, %v2668_v23 }
 0x550   : > { %v2680_v26 = vadd.f32 %v3538_v24, %v3008_v22  ;;  %v2671_v8 = vpop.f32.mrb[7].mxu1 }
 0x551   : > { %v2672_v27 = vadd.f32 %v3008_v22, %v2671_v8 }
 0x552   : > { %v3056_v28 = vpack.c.bf16 %v2680_v26, %v2677_v25 }
 0x553   : > { %v3051_v29 = vpack.c.bf16 %v2672_v27, %v2669_v14 }
 0x554   : > { %3060 = vst [vmem:[%s4659_s24 + $0x8] sm:$0xff] %v3056_v28  }
 0x555   : > { %3052 = vst [vmem:[%s4659_s24] sm:$0xff] %v3051_v29  }
 0x556   : > { %3996 = shalt.err (!%p3993_p11)
}
 0x557   : > { %s3997_s24 = scalar_lea.hbm %s4713_s23, 256  ;;  %s4001_s0 = scalar_lea.hbm %s4856_s19, 1024 }
 0x558   : > { %p3998_p0 = scmp.ne.s32.totalorder %s4713_s23, %s3997_s24  ;;  %p4002_p5 = scmp.lt.u32.totalorder %s4713_s23, %s4856_s19 }
 0x559   : > { %p4003_p9 = scmp.lt.u32.totalorder %s4001_s0, %s3997_s24  ;;  %p4005_p1 = scmp.lt.u32.totalorder %s3997_s24, %s4713_s23 }
 0x55a   : > { %p3999_p8 = pnand %p3998_p0, %p4857_p2 }
 0x55b   : > { %p4004_p13 = por %p4003_p9, %p4002_p5 }
 0x55c   : > { %p4000_p10 = pneg %p3999_p8 }
 0x55d   : > { %p4006_p12 = por %p4005_p1, %p4004_p13 }
 0x55f   : > { %p4007_p7 = pnand %p4006_p12, %p4000_p10 }
 0x561   : > { %4010 = shalt.err (!%p4007_p7)
}
 0x562   : > { %s4132_s26 = smov 64   ;;  %s4133_s25 = smov 4  }
 0x563   : > { %3587 = dma.vmem_to_hbm [thread:$0]  (%p4857_p2), %s4715_s7, 256, %s4713_s23, %s2692_s4, %s4132_s26, %s4132_s26, %s4133_s25  }
 0x564 PF: > { %s4858_s8 = sld [smem:[#allocation21_spill]]  ;;  %s4859_s27 = sld [smem:[#allocation25_spill]] }
 0x565   : > { %p3617_p4 = scmp.ge.s32.totalorder %s4117_s15, 2 }
 0x56a   : > { %s2722_s6 = sand.u32 1, %s4858_s8   ;;  %p4860_p6 = scmp.ne.s32.totalorder %s4859_s27, 0 }
 0x56b   : > { %s2723_s12 = scalar_lea.sflag [#allocation8], %s2722_s6 }
 0x56c   : > { %p3607_p3 = pnand %p3617_p4, %p4860_p6 }
 0x56e   : > { %4072 = dma.done.wait (!%p3607_p3), %s2723_s12, 256  }
 0x56f   : > { %4074 = vsyncadd (!%p3607_p3), %s2723_s12, 4294967040  ;;  %s28_s15 = sadd.s32 1, %s4117_s15   ;;  %s4861_s5 = smov %s4874_s30 }
 0x570   : > { %p25_p11 = scmp.ge.s32.totalorder %s28_s15, 6   ;;  %s4862_s3 = sld [smem:[#allocation26_spill]] }
 0x571   : > { %s4863_s27 = smov %s4081_s28  ;;  %s4864_s28 = smov %s4085_s29 }
 0x572   : > { %s4865_s29 = smov %s4451_s2  ;;  %s4866_s30 = smov %s4093_s9 }
 0x573   : > { %s4867_s9 = smov %s4097_s10  ;;  %s4868_s10 = smov %s4440_s18 }
 0x574   : > { %s4869_s11 = smov %s4109_s13  ;;  %s4870_s12 = smov %s4113_s14 }
 0x575   : > { %s4871_s13 = smov %s4861_s5  ;;  %27 = sbr.rel (!%p25_p11) target bundleno = 21 (0x15), region = 136 }
 0x576   : > { %s4872_s14 = smov %s4862_s3 }
 0x57c   :  { %2728 = vsyncpa [#allocation7], 1 }
 0x57d   :  { %2730 = vsyncpa [#allocation7 + $0x1], 1 }
 0x57e   :  { %2731 = vsyncpa [#allocation10], 1 }
 0x57f   :  { %2733 = vsyncpa [#allocation10 + $0x1], 1 }
 0x580   :  { %2734 = vsyncpa [#allocation13], 1 }
 0x581   :  { %2735 = vsyncpa [#allocation8], 1 }
 0x582   :  { %2737 = vsyncpa [#allocation8 + $0x1], 1 }

</bundles_post_ra>
